<compile_context>
chip_gen: v5e
topology: v5e:2x2
jax: 0.10.0
libtpu: 0.0.40
codegen_flags: <defaults>
</compile_context>

<pallas_src>
import functools

import jax
import jax.numpy as jnp
from jax.experimental import pallas as pl
from jax.experimental.pallas import tpu as pltpu


def _round_up(x, m):
    return ((x + m - 1) // m) * m


# ----------------------------------------------------------------------------
# Pallas kernel: one grid step == (one batch element, one layer).
# The activation is carried across the layer axis inside o_ref (its block index
# is constant over that axis, so the block stays resident in VMEM).
# ----------------------------------------------------------------------------
def transformer_stack_kernel(h_in_ref, bias_ref, pack_ref, wqkv_ref, wo_ref,
                             w1_ref, w2_ref, o_ref, *,
                             seq, e_true, e_pad, hid_pad, num_heads, dh_pad):
    S, E, Ep, H, Dhp, HIDp = seq, e_true, e_pad, num_heads, dh_pad, hid_pad
    HD = H * Dhp

    layer = pl.program_id(1)

    # Layer 0: initialize the carried activation from the embedded input.
    @pl.when(layer == 0)
    def _():
        o_ref[...] = h_in_ref[...]

    h = o_ref[0]                                   # [S, Ep] f32 (padded lanes == 0)

    # Per-layer params (pre-transposed / zero-padded / bf16 on host).
    pk   = pack_ref[0]                             # [8, PACK_W] f32
    wqkv = wqkv_ref[0]                             # [Ep, 3*H*Dhp] bf16 (Q pre-scaled)
    wo   = wo_ref[0]                               # [H*Dhp, Ep]   bf16
    w1   = w1_ref[0]                               # [Ep, HIDp]    bf16
    w2   = w2_ref[0]                               # [HIDp, Ep]    bf16

    ln1_g = pk[0:1, 0:Ep]
    ln1_b = pk[1:2, 0:Ep]
    b_qkv = pk[2:3, 0:3 * HD]
    b_o   = pk[3:4, 0:Ep]
    ln2_g = pk[4:5, 0:Ep]
    ln2_b = pk[5:6, 0:Ep]
    b_1   = pk[6:7, 0:HIDp]
    b_2   = pk[7:8, 0:Ep]

    inv_e = 1.0 / float(E)

    def layernorm(x, g, b):
        # Padded lanes (>= E) are exactly zero and have zero gamma/beta, so
        # true-E statistics can be computed over the padded width.
        mu = jnp.sum(x, axis=-1, keepdims=True) * inv_e
        ex2 = jnp.sum(x * x, axis=-1, keepdims=True) * inv_e
        var = jnp.maximum(ex2 - mu * mu, 0.0)
        return (x - mu) * jax.lax.rsqrt(var + 1e-12) * g + b    # eps = 1e-12

    # ---- LayerNorm 1 (f32) ----
    hn = layernorm(h, ln1_g, ln1_b)                              # [S, Ep]

    # ---- Fused QKV projection (bf16 operands, f32 accumulation) ----
    qkv = jnp.dot(hn.astype(jnp.bfloat16), wqkv,
                  preferred_element_type=jnp.float32) + b_qkv    # [S, 3*HD] f32

    # Lane-aligned slices (HD is a multiple of 128), head-major layout.
    q = jnp.transpose(qkv[:, 0:HD].reshape(S, H, Dhp), (1, 0, 2))          # [H,S,Dhp]
    k = jnp.transpose(qkv[:, HD:2 * HD].reshape(S, H, Dhp), (1, 0, 2))
    v = jnp.transpose(qkv[:, 2 * HD:3 * HD].reshape(S, H, Dhp), (1, 0, 2))

    # ---- Multi-head attention: all heads in one batched MXU call ----
    s = jnp.einsum('hqd,hkd->hqk', q.astype(jnp.bfloat16), k.astype(jnp.bfloat16),
                   preferred_element_type=jnp.float32)           # [H, S, S]
    s = s + bias_ref[...]                                        # additive causal bias
    s = s - jnp.max(s, axis=-1, keepdims=True)
    p = jnp.exp(s)
    p = p / jnp.sum(p, axis=-1, keepdims=True)                   # exact normalization
    ctx = jnp.einsum('hqk,hkd->hqd', p.astype(jnp.bfloat16), v.astype(jnp.bfloat16),
                     preferred_element_type=jnp.float32)         # [H, S, Dhp]
    ctx = jnp.transpose(ctx, (1, 0, 2)).reshape(S, HD)           # [S, HD]
    attn = jnp.dot(ctx.astype(jnp.bfloat16), wo,
                   preferred_element_type=jnp.float32) + b_o     # [S, Ep]

    # Residual against the LN1 output (matches the reference forward()).
    h2 = attn + hn

    # ---- LayerNorm 2 + feed-forward (Linear -> ReLU -> Linear) ----
    h2n = layernorm(h2, ln2_g, ln2_b)
    f = jnp.dot(h2n.astype(jnp.bfloat16), w1,
                preferred_element_type=jnp.float32) + b_1
    f = jnp.maximum(f, 0.0)
    f = jnp.dot(f.astype(jnp.bfloat16), w2,
                preferred_element_type=jnp.float32) + b_2

    o_ref[0] = f + h2n


# ----------------------------------------------------------------------------
# Host-side parameter preprocessing (once):
#   * stack per-layer weights along a leading L axis, pre-transpose them,
#   * fold 1/sqrt(Dh) into the Q projection,
#   * zero-pad E/Dh/HID to multiples of 128 lanes (lane-dense kernel),
#   * cast all weight matrices to bf16,
#   * pack all small per-layer vectors into one [L, 8, PACK_W] f32 array.
# ----------------------------------------------------------------------------
def _stack_layer_params(params, *, num_heads):
    E = params["tok_emb"].shape[1]
    HID = params["layers"][0]["w1"].shape[0]
    H = num_heads
    Dh = E // H
    Ep = _round_up(E, 128)
    Dhp = _round_up(Dh, 128)
    HIDp = _round_up(HID, 128)
    HD = H * Dhp
    scale = 1.0 / float(Dh) ** 0.5
    pack_w = max(3 * HD, Ep, HIDp)

    packs, wqkv_l, wo_l, w1_l, w2_l = [], [], [], [], []
    for lp in params["layers"]:
        # in_proj weight [3E, E] -> [E, 3, H, Dh]; scale Q; pad head dim to Dhp.
        wt = jnp.asarray(lp["w_qkv"], jnp.float32).T.reshape(E, 3, H, Dh)
        wt = wt.at[:, 0].multiply(scale)
        wqkv_p = jnp.zeros((Ep, 3, H, Dhp), jnp.float32)
        wqkv_p = wqkv_p.at[:E, :, :, :Dh].set(wt).reshape(Ep, 3 * HD)

        bq = jnp.asarray(lp["b_qkv"], jnp.float32).reshape(3, H, Dh)
        bq = bq.at[0].multiply(scale)
        bq_p = jnp.zeros((3, H, Dhp), jnp.float32).at[:, :, :Dh].set(bq)
        bq_p = bq_p.reshape(3 * HD)

        wo_t = jnp.asarray(lp["w_o"], jnp.float32).T.reshape(H, Dh, E)
        wo_p = jnp.zeros((H, Dhp, Ep), jnp.float32)
        wo_p = wo_p.at[:, :Dh, :E].set(wo_t).reshape(HD, Ep)

        w1_p = jnp.zeros((Ep, HIDp), jnp.float32).at[:E, :HID].set(
            jnp.asarray(lp["w1"], jnp.float32).T)
        w2_p = jnp.zeros((HIDp, Ep), jnp.float32).at[:HID, :E].set(
            jnp.asarray(lp["w2"], jnp.float32).T)

        pack = jnp.zeros((8, pack_w), jnp.float32)
        pack = pack.at[0, :E].set(lp["ln1_g"].reshape(E))
        pack = pack.at[1, :E].set(lp["ln1_b"].reshape(E))
        pack = pack.at[2, :3 * HD].set(bq_p)
        pack = pack.at[3, :E].set(lp["b_o"].reshape(E))
        pack = pack.at[4, :E].set(lp["ln2_g"].reshape(E))
        pack = pack.at[5, :E].set(lp["ln2_b"].reshape(E))
        pack = pack.at[6, :HID].set(lp["b1"].reshape(HID))
        pack = pack.at[7, :E].set(lp["b2"].reshape(E))

        packs.append(pack)
        wqkv_l.append(wqkv_p.astype(jnp.bfloat16))
        wo_l.append(wo_p.astype(jnp.bfloat16))
        w1_l.append(w1_p.astype(jnp.bfloat16))
        w2_l.append(w2_p.astype(jnp.bfloat16))

    return {
        "pack": jnp.stack(packs),        # [L, 8, PACK_W] f32
        "wqkv": jnp.stack(wqkv_l),       # [L, Ep, 3*H*Dhp] bf16
        "wo":   jnp.stack(wo_l),         # [L, H*Dhp, Ep]   bf16
        "w1":   jnp.stack(w1_l),         # [L, Ep, HIDp]    bf16
        "w2":   jnp.stack(w2_l),         # [L, HIDp, Ep]    bf16
        "dims": (E, Ep, Dhp, HIDp, HD),
    }


def transformer_forward(x_sb, params, *, num_heads, causal):
    """x_sb: int32 token ids of shape [seq, batch] (PyTorch convention)."""
    S, B = x_sb.shape
    L = len(params["layers"])

    stacked = _stack_layer_params(params, num_heads=num_heads)
    E, Ep, Dhp, HIDp, HD = stacked["dims"]
    pack_w = stacked["pack"].shape[-1]

    # Embedding gathers + position add (glue, plain JAX). Dropout is identity.
    tok = params["tok_emb"][x_sb]                          # [S, B, E]
    pos = params["pos_emb"][jnp.arange(S)]                 # [S, E]
    h = (tok + pos[:, None, :]).astype(jnp.float32)
    h = jnp.transpose(h, (1, 0, 2))                        # [B, S, E]
    h = jnp.pad(h, ((0, 0), (0, 0), (0, Ep - E)))          # lane-dense [B, S, Ep]

    # Layer-invariant additive attention bias, built once on the host.
    if causal:
        r = jnp.arange(S)
        bias = jnp.where(r[None, :] <= r[:, None], 0.0, -1e30).astype(jnp.float32)
    else:
        bias = jnp.zeros((S, S), jnp.float32)

    kernel = functools.partial(
        transformer_stack_kernel,
        seq=S, e_true=E, e_pad=Ep, hid_pad=HIDp,
        num_heads=num_heads, dh_pad=Dhp,
    )

    out = pl.pallas_call(
        kernel,
        out_shape=jax.ShapeDtypeStruct((B, S, Ep), jnp.float32),
        grid=(B, L),
        in_specs=[
            pl.BlockSpec((1, S, Ep), lambda b, l: (b, 0, 0)),        # embedded input
            pl.BlockSpec((S, S), lambda b, l: (0, 0)),               # causal bias (resident)
            pl.BlockSpec((1, 8, pack_w), lambda b, l: (l, 0, 0)),    # packed LN/bias vecs
            pl.BlockSpec((1, Ep, 3 * HD), lambda b, l: (l, 0, 0)),   # W_qkv^T (Q pre-scaled)
            pl.BlockSpec((1, HD, Ep), lambda b, l: (l, 0, 0)),       # W_o^T
            pl.BlockSpec((1, Ep, HIDp), lambda b, l: (l, 0, 0)),     # W1^T
            pl.BlockSpec((1, HIDp, Ep), lambda b, l: (l, 0, 0)),     # W2^T
        ],
        out_specs=pl.BlockSpec((1, S, Ep), lambda b, l: (b, 0, 0)),  # activation carry
        compiler_params=pltpu.CompilerParams(
            dimension_semantics=("parallel", "arbitrary"),
            vmem_limit_bytes=32 * 1024 * 1024),
    )(h, bias, stacked["pack"], stacked["wqkv"], stacked["wo"],
      stacked["w1"], stacked["w2"])

    out = out[:, :, :E]                                    # drop lane padding
    return jnp.transpose(out, (1, 0, 2))                   # -> [S, B, E]


# ----------------------------------------------------------------------------
# Deterministic synthetic parameters (shapes follow the PyTorch __init__).
# ----------------------------------------------------------------------------
def init_params(key, *, num_embeddings, num_max_positions, embed_dim,
                hidden_dim, num_layers):
    def nrm(k, shape, scale=0.02):
        return (scale * jax.random.normal(k, shape)).astype(jnp.float32)

    keys = jax.random.split(key, 2 + 6 * num_layers)
    params = {
        "tok_emb": nrm(keys[0], (num_embeddings, embed_dim)),
        "pos_emb": nrm(keys[1], (num_max_positions, embed_dim)),
        "layers": [],
    }
    kidx = 2
    for _ in range(num_layers):
        lk = keys[kidx:kidx + 6]
        kidx += 6
        params["layers"].append({
            "ln1_g": jnp.ones((1, embed_dim), jnp.float32),
            "ln1_b": jnp.zeros((1, embed_dim), jnp.float32),
            "w_qkv": nrm(lk[0], (3 * embed_dim, embed_dim)),
            "b_qkv": nrm(lk[1], (1, 3 * embed_dim)),
            "w_o":   nrm(lk[2], (embed_dim, embed_dim)),
            "b_o":   jnp.zeros((1, embed_dim), jnp.float32),
            "ln2_g": jnp.ones((1, embed_dim), jnp.float32),
            "ln2_b": jnp.zeros((1, embed_dim), jnp.float32),
            "w1":    nrm(lk[3], (hidden_dim, embed_dim)),
            "b1":    nrm(lk[4], (1, hidden_dim)),
            "w2":    nrm(lk[5], (embed_dim, hidden_dim)),
            "b2":    jnp.zeros((1, embed_dim), jnp.float32),
        })
    return params


if __name__ == "__main__":
    # Small config consistent with the module's constructor.
    EMBED_DIM = 32
    HIDDEN_DIM = 64
    NUM_EMBEDDINGS = 100
    NUM_MAX_POSITIONS = 16
    NUM_HEADS = 4
    NUM_LAYERS = 2
    CAUSAL = True
    SEQ, BATCH = 8, 2

    key = jax.random.PRNGKey(0)
    k_param, k_x = jax.random.split(key)
    params = init_params(
        k_param,
        num_embeddings=NUM_EMBEDDINGS,
        num_max_positions=NUM_MAX_POSITIONS,
        embed_dim=EMBED_DIM,
        hidden_dim=HIDDEN_DIM,
        num_layers=NUM_LAYERS,
    )

    x = jax.random.randint(k_x, (SEQ, BATCH), 0, NUM_EMBEDDINGS, dtype=jnp.int32)

    out = transformer_forward(x, params, num_heads=NUM_HEADS, causal=CAUSAL)
    out = jax.block_until_ready(out)
    assert out.shape == (SEQ, BATCH, EMBED_DIM)
    print("KERNEL_OK")
</pallas_src>

<mosaic_0001>
module attributes {stable_mosaic.version = 11 : i64} {
  func.func @transformer_stack_kernel(%arg0: i32, %arg1: i32, %arg2: memref<1x8x128xf32, #tpu.memory_space<vmem>>, %arg3: memref<8x8xf32, #tpu.memory_space<vmem>>, %arg4: memref<1x8x1536xf32, #tpu.memory_space<vmem>>, %arg5: memref<1x128x1536xbf16, #tpu.memory_space<vmem>>, %arg6: memref<1x512x128xbf16, #tpu.memory_space<vmem>>, %arg7: memref<1x128x128xbf16, #tpu.memory_space<vmem>>, %arg8: memref<1x128x128xbf16, #tpu.memory_space<vmem>>, %arg9: memref<1x8x128xf32, #tpu.memory_space<vmem>>) attributes {dimension_semantics = [#tpu.dimension_semantics<parallel>, #tpu.dimension_semantics<arbitrary>], iteration_bounds = array<i64: 2, 2>, scalar_prefetch = 0 : i64, scratch_operands = 0 : i64, tpu.core_type = #tpu.core_type<tc>, window_params = [{transform_indices = @transform_0, window_bounds = array<i64: 1, 8, 128>}, {pipeline_mode = #tpu.pipeline_mode<synchronous>, transform_indices = @transform_1, window_bounds = array<i64: 8, 8>}, {transform_indices = @transform_2, window_bounds = array<i64: 1, 8, 1536>}, {transform_indices = @transform_3, window_bounds = array<i64: 1, 128, 1536>}, {transform_indices = @transform_4, window_bounds = array<i64: 1, 512, 128>}, {transform_indices = @transform_5, window_bounds = array<i64: 1, 128, 128>}, {transform_indices = @transform_6, window_bounds = array<i64: 1, 128, 128>}, {transform_indices = @transform_7, window_bounds = array<i64: 1, 8, 128>}]} {
    %c0_i32 = arith.constant 0 : i32
    %0 = arith.cmpi eq, %arg1, %c0_i32 : i32
    %1 = arith.extui %0 : i1 to i32
    %c0_i32_0 = arith.constant 0 : i32
    %2 = arith.cmpi ne, %1, %c0_i32_0 : i32
    scf.if %2 {
      %c0_43 = arith.constant 0 : index
      %c0_44 = arith.constant 0 : index
      %c0_45 = arith.constant 0 : index
      %124 = vector.load %arg2[%c0_43, %c0_44, %c0_45] : memref<1x8x128xf32, #tpu.memory_space<vmem>>, vector<1x8x128xf32>
      %c0_46 = arith.constant 0 : index
      %c0_47 = arith.constant 0 : index
      %c0_48 = arith.constant 0 : index
      %125 = vector.load %arg9[%c0_46, %c0_47, %c0_48] : memref<1x8x128xf32, #tpu.memory_space<vmem>>, vector<1x8x128xf32>
      tpu.vector_store %arg9[%c0_46, %c0_47, %c0_48], %124 {strides = array<i32>} : memref<1x8x128xf32, #tpu.memory_space<vmem>>, vector<1x8x128xf32>,
    } else {
    }
    %c0 = arith.constant 0 : index
    %c0_1 = arith.constant 0 : index
    %c0_2 = arith.constant 0 : index
    %3 = vector.load %arg9[%c0, %c0_1, %c0_2] : memref<1x8x128xf32, #tpu.memory_space<vmem>>, vector<1x8x128xf32>
    %4 = vector.shape_cast %3 : vector<1x8x128xf32> to vector<8x128xf32>
    %c0_3 = arith.constant 0 : index
    %c0_4 = arith.constant 0 : index
    %c0_5 = arith.constant 0 : index
    %5 = vector.load %arg4[%c0_3, %c0_4, %c0_5] : memref<1x8x1536xf32, #tpu.memory_space<vmem>>, vector<1x8x1536xf32>
    %6 = vector.shape_cast %5 : vector<1x8x1536xf32> to vector<8x1536xf32>
    %c0_6 = arith.constant 0 : index
    %c0_7 = arith.constant 0 : index
    %c0_8 = arith.constant 0 : index
    %7 = vector.load %arg5[%c0_6, %c0_7, %c0_8] : memref<1x128x1536xbf16, #tpu.memory_space<vmem>>, vector<1x128x1536xbf16>
    %8 = vector.shape_cast %7 : vector<1x128x1536xbf16> to vector<128x1536xbf16>
    %c0_9 = arith.constant 0 : index
    %c0_10 = arith.constant 0 : index
    %c0_11 = arith.constant 0 : index
    %9 = vector.load %arg6[%c0_9, %c0_10, %c0_11] : memref<1x512x128xbf16, #tpu.memory_space<vmem>>, vector<1x512x128xbf16>
    %10 = vector.shape_cast %9 : vector<1x512x128xbf16> to vector<512x128xbf16>
    %c0_12 = arith.constant 0 : index
    %c0_13 = arith.constant 0 : index
    %c0_14 = arith.constant 0 : index
    %11 = vector.load %arg7[%c0_12, %c0_13, %c0_14] : memref<1x128x128xbf16, #tpu.memory_space<vmem>>, vector<1x128x128xbf16>
    %12 = vector.shape_cast %11 : vector<1x128x128xbf16> to vector<128x128xbf16>
    %c0_15 = arith.constant 0 : index
    %c0_16 = arith.constant 0 : index
    %c0_17 = arith.constant 0 : index
    %13 = vector.load %arg8[%c0_15, %c0_16, %c0_17] : memref<1x128x128xbf16, #tpu.memory_space<vmem>>, vector<1x128x128xbf16>
    %14 = vector.shape_cast %13 : vector<1x128x128xbf16> to vector<128x128xbf16>
    %15 = vector.extract_strided_slice %6 {offsets = [0, 0], sizes = [1, 128], strides = [1, 1]} : vector<8x1536xf32> to vector<1x128xf32>
    %16 = vector.extract_strided_slice %6 {offsets = [1, 0], sizes = [1, 128], strides = [1, 1]} : vector<8x1536xf32> to vector<1x128xf32>
    %17 = vector.extract_strided_slice %6 {offsets = [2, 0], sizes = [1, 1536], strides = [1, 1]} : vector<8x1536xf32> to vector<1x1536xf32>
    %18 = vector.extract_strided_slice %6 {offsets = [3, 0], sizes = [1, 128], strides = [1, 1]} : vector<8x1536xf32> to vector<1x128xf32>
    %19 = vector.extract_strided_slice %6 {offsets = [4, 0], sizes = [1, 128], strides = [1, 1]} : vector<8x1536xf32> to vector<1x128xf32>
    %20 = vector.extract_strided_slice %6 {offsets = [5, 0], sizes = [1, 128], strides = [1, 1]} : vector<8x1536xf32> to vector<1x128xf32>
    %21 = vector.extract_strided_slice %6 {offsets = [6, 0], sizes = [1, 128], strides = [1, 1]} : vector<8x1536xf32> to vector<1x128xf32>
    %22 = vector.extract_strided_slice %6 {offsets = [7, 0], sizes = [1, 128], strides = [1, 1]} : vector<8x1536xf32> to vector<1x128xf32>
    %cst = arith.constant dense<0.000000e+00> : vector<8xf32>
    %23 = vector.multi_reduction <add>, %4, %cst [1] : vector<8x128xf32> to vector<8xf32>
    %24 = vector.shape_cast %23 : vector<8xf32> to vector<8x1xf32>
    %cst_18 = arith.constant 3.125000e-02 : f32
    %25 = vector.broadcast %cst_18 : f32 to vector<8x1xf32>
    %26 = arith.mulf %24, %25 : vector<8x1xf32>
    %27 = arith.mulf %4, %4 : vector<8x128xf32>
    %cst_19 = arith.constant dense<0.000000e+00> : vector<8xf32>
    %28 = vector.multi_reduction <add>, %27, %cst_19 [1] : vector<8x128xf32> to vector<8xf32>
    %29 = vector.shape_cast %28 : vector<8xf32> to vector<8x1xf32>
    %cst_20 = arith.constant 3.125000e-02 : f32
    %30 = vector.broadcast %cst_20 : f32 to vector<8x1xf32>
    %31 = arith.mulf %29, %30 : vector<8x1xf32>
    %32 = arith.mulf %26, %26 : vector<8x1xf32>
    %33 = arith.subf %31, %32 : vector<8x1xf32>
    %cst_21 = arith.constant 0.000000e+00 : f32
    %34 = vector.broadcast %cst_21 : f32 to vector<8x1xf32>
    %35 = arith.maximumf %33, %34 : vector<8x1xf32>
    %36 = vector.broadcast %26 : vector<8x1xf32> to vector<8x128xf32>
    %37 = arith.subf %4, %36 : vector<8x128xf32>
    %cst_22 = arith.constant 9.99999996E-13 : f32
    %38 = vector.broadcast %cst_22 : f32 to vector<8x1xf32>
    %39 = arith.addf %35, %38 : vector<8x1xf32>
    %40 = math.rsqrt %39 : vector<8x1xf32>
    %41 = vector.broadcast %40 : vector<8x1xf32> to vector<8x128xf32>
    %42 = arith.mulf %37, %41 : vector<8x128xf32>
    %43 = vector.broadcast %15 : vector<1x128xf32> to vector<8x128xf32>
    %44 = arith.mulf %42, %43 : vector<8x128xf32>
    %45 = vector.broadcast %16 : vector<1x128xf32> to vector<8x128xf32>
    %46 = arith.addf %44, %45 : vector<8x128xf32>
    %47 = arith.truncf %46 : vector<8x128xf32> to vector<8x128xbf16>
    %cst_23 = arith.constant dense<0.000000e+00> : vector<8x1536xf32>
    %48 = tpu.matmul %47, %8, %cst_23 {dimension_numbers = #tpu.dot_dimension_numbers<[1], [0], [0], [1], [0, 0, 1, 1], [], []>} : vector<8x128xbf16>, vector<128x1536xbf16>, vector<8x1536xf32> -> vector<8x1536xf32>
    %49 = vector.broadcast %17 : vector<1x1536xf32> to vector<8x1536xf32>
    %50 = arith.addf %48, %49 : vector<8x1536xf32>
    %51 = vector.extract_strided_slice %50 {offsets = [0, 0], sizes = [8, 512], strides = [1, 1]} : vector<8x1536xf32> to vector<8x512xf32>
    %52 = vector.shape_cast %51 : vector<8x512xf32> to vector<8x4x128xf32>
    %53 = tpu.transpose %52, [1, 0, 2] : vector<8x4x128xf32> -> vector<4x8x128xf32>
    %54 = vector.extract_strided_slice %50 {offsets = [0, 512], sizes = [8, 512], strides = [1, 1]} : vector<8x1536xf32> to vector<8x512xf32>
    %55 = vector.shape_cast %54 : vector<8x512xf32> to vector<8x4x128xf32>
    %56 = tpu.transpose %55, [1, 0, 2] : vector<8x4x128xf32> -> vector<4x8x128xf32>
    %57 = vector.extract_strided_slice %50 {offsets = [0, 1024], sizes = [8, 512], strides = [1, 1]} : vector<8x1536xf32> to vector<8x512xf32>
    %58 = vector.shape_cast %57 : vector<8x512xf32> to vector<8x4x128xf32>
    %59 = tpu.transpose %58, [1, 0, 2] : vector<8x4x128xf32> -> vector<4x8x128xf32>
    %60 = arith.truncf %53 : vector<4x8x128xf32> to vector<4x8x128xbf16>
    %61 = arith.truncf %56 : vector<4x8x128xf32> to vector<4x8x128xbf16>
    "tpu.trace_start"() <{level = 10 : i32, message = "hqd,hkd->hqk"}> : () -> ()
    %cst_24 = arith.constant dense<0.000000e+00> : vector<4x8x8xf32>
    %62 = tpu.matmul %60, %61, %cst_24 {dimension_numbers = #tpu.dot_dimension_numbers<[2], [2], [1], [1], [0, 0, 0, 1, 1, 1], [0], [0]>} : vector<4x8x128xbf16>, vector<4x8x128xbf16>, vector<4x8x8xf32> -> vector<4x8x8xf32>
    "tpu.trace_stop"() : () -> ()
    %c0_25 = arith.constant 0 : index
    %c0_26 = arith.constant 0 : index
    %63 = vector.load %arg3[%c0_25, %c0_26] : memref<8x8xf32, #tpu.memory_space<vmem>>, vector<8x8xf32>
    %64 = vector.shape_cast %63 : vector<8x8xf32> to vector<1x8x8xf32>
    %65 = vector.broadcast %64 : vector<1x8x8xf32> to vector<4x8x8xf32>
    %66 = arith.addf %62, %65 : vector<4x8x8xf32>
    %cst_27 = arith.constant dense<0xFF800000> : vector<4x8xf32>
    %67 = vector.multi_reduction <maximumf>, %66, %cst_27 [2] : vector<4x8x8xf32> to vector<4x8xf32>
    %68 = vector.shape_cast %67 : vector<4x8xf32> to vector<4x8x1xf32>
    %69 = vector.broadcast %68 : vector<4x8x1xf32> to vector<4x8x8xf32>
    %70 = arith.subf %66, %69 : vector<4x8x8xf32>
    %71 = math.exp %70 : vector<4x8x8xf32>
    %cst_28 = arith.constant dense<0.000000e+00> : vector<4x8xf32>
    %72 = vector.multi_reduction <add>, %71, %cst_28 [2] : vector<4x8x8xf32> to vector<4x8xf32>
    %73 = vector.shape_cast %72 : vector<4x8xf32> to vector<4x8x1xf32>
    %74 = vector.broadcast %73 : vector<4x8x1xf32> to vector<4x8x8xf32>
    %75 = arith.divf %71, %74 : vector<4x8x8xf32>
    %76 = arith.truncf %75 : vector<4x8x8xf32> to vector<4x8x8xbf16>
    %77 = arith.truncf %59 : vector<4x8x128xf32> to vector<4x8x128xbf16>
    "tpu.trace_start"() <{level = 10 : i32, message = "hqk,hkd->hqd"}> : () -> ()
    %cst_29 = arith.constant dense<0.000000e+00> : vector<4x8x128xf32>
    %78 = tpu.matmul %76, %77, %cst_29 {dimension_numbers = #tpu.dot_dimension_numbers<[2], [1], [1], [2], [0, 0, 0, 1, 1, 2], [0], [0]>} : vector<4x8x8xbf16>, vector<4x8x128xbf16>, vector<4x8x128xf32> -> vector<4x8x128xf32>
    "tpu.trace_stop"() : () -> ()
    %79 = tpu.transpose %78, [1, 0, 2] : vector<4x8x128xf32> -> vector<8x4x128xf32>
    %80 = vector.shape_cast %79 : vector<8x4x128xf32> to vector<8x512xf32>
    %81 = arith.truncf %80 : vector<8x512xf32> to vector<8x512xbf16>
    %cst_30 = arith.constant dense<0.000000e+00> : vector<8x128xf32>
    %82 = tpu.matmul %81, %10, %cst_30 {dimension_numbers = #tpu.dot_dimension_numbers<[1], [0], [0], [1], [0, 0, 1, 1], [], []>} : vector<8x512xbf16>, vector<512x128xbf16>, vector<8x128xf32> -> vector<8x128xf32>
    %83 = vector.broadcast %18 : vector<1x128xf32> to vector<8x128xf32>
    %84 = arith.addf %82, %83 : vector<8x128xf32>
    %85 = arith.addf %84, %46 : vector<8x128xf32>
    %cst_31 = arith.constant dense<0.000000e+00> : vector<8xf32>
    %86 = vector.multi_reduction <add>, %85, %cst_31 [1] : vector<8x128xf32> to vector<8xf32>
    %87 = vector.shape_cast %86 : vector<8xf32> to vector<8x1xf32>
    %cst_32 = arith.constant 3.125000e-02 : f32
    %88 = vector.broadcast %cst_32 : f32 to vector<8x1xf32>
    %89 = arith.mulf %87, %88 : vector<8x1xf32>
    %90 = arith.mulf %85, %85 : vector<8x128xf32>
    %cst_33 = arith.constant dense<0.000000e+00> : vector<8xf32>
    %91 = vector.multi_reduction <add>, %90, %cst_33 [1] : vector<8x128xf32> to vector<8xf32>
    %92 = vector.shape_cast %91 : vector<8xf32> to vector<8x1xf32>
    %cst_34 = arith.constant 3.125000e-02 : f32
    %93 = vector.broadcast %cst_34 : f32 to vector<8x1xf32>
    %94 = arith.mulf %92, %93 : vector<8x1xf32>
    %95 = arith.mulf %89, %89 : vector<8x1xf32>
    %96 = arith.subf %94, %95 : vector<8x1xf32>
    %cst_35 = arith.constant 0.000000e+00 : f32
    %97 = vector.broadcast %cst_35 : f32 to vector<8x1xf32>
    %98 = arith.maximumf %96, %97 : vector<8x1xf32>
    %99 = vector.broadcast %89 : vector<8x1xf32> to vector<8x128xf32>
    %100 = arith.subf %85, %99 : vector<8x128xf32>
    %cst_36 = arith.constant 9.99999996E-13 : f32
    %101 = vector.broadcast %cst_36 : f32 to vector<8x1xf32>
    %102 = arith.addf %98, %101 : vector<8x1xf32>
    %103 = math.rsqrt %102 : vector<8x1xf32>
    %104 = vector.broadcast %103 : vector<8x1xf32> to vector<8x128xf32>
    %105 = arith.mulf %100, %104 : vector<8x128xf32>
    %106 = vector.broadcast %19 : vector<1x128xf32> to vector<8x128xf32>
    %107 = arith.mulf %105, %106 : vector<8x128xf32>
    %108 = vector.broadcast %20 : vector<1x128xf32> to vector<8x128xf32>
    %109 = arith.addf %107, %108 : vector<8x128xf32>
    %110 = arith.truncf %109 : vector<8x128xf32> to vector<8x128xbf16>
    %cst_37 = arith.constant dense<0.000000e+00> : vector<8x128xf32>
    %111 = tpu.matmul %110, %12, %cst_37 {dimension_numbers = #tpu.dot_dimension_numbers<[1], [0], [0], [1], [0, 0, 1, 1], [], []>} : vector<8x128xbf16>, vector<128x128xbf16>, vector<8x128xf32> -> vector<8x128xf32>
    %112 = vector.broadcast %21 : vector<1x128xf32> to vector<8x128xf32>
    %113 = arith.addf %111, %112 : vector<8x128xf32>
    %cst_38 = arith.constant 0.000000e+00 : f32
    %114 = vector.broadcast %cst_38 : f32 to vector<8x128xf32>
    %115 = arith.maximumf %113, %114 : vector<8x128xf32>
    %116 = arith.truncf %115 : vector<8x128xf32> to vector<8x128xbf16>
    %cst_39 = arith.constant dense<0.000000e+00> : vector<8x128xf32>
    %117 = tpu.matmul %116, %14, %cst_39 {dimension_numbers = #tpu.dot_dimension_numbers<[1], [0], [0], [1], [0, 0, 1, 1], [], []>} : vector<8x128xbf16>, vector<128x128xbf16>, vector<8x128xf32> -> vector<8x128xf32>
    %118 = vector.broadcast %22 : vector<1x128xf32> to vector<8x128xf32>
    %119 = arith.addf %117, %118 : vector<8x128xf32>
    %120 = arith.addf %119, %109 : vector<8x128xf32>
    %c0_40 = arith.constant 0 : index
    %c0_41 = arith.constant 0 : index
    %c0_42 = arith.constant 0 : index
    %121 = vector.load %arg9[%c0_40, %c0_41, %c0_42] : memref<1x8x128xf32, #tpu.memory_space<vmem>>, vector<1x8x128xf32>
    %122 = vector.shape_cast %121 : vector<1x8x128xf32> to vector<8x128xf32>
    %123 = vector.shape_cast %120 : vector<8x128xf32> to vector<1x8x128xf32>
    tpu.vector_store %arg9[%c0_40, %c0_41, %c0_42], %123 {strides = array<i32>} : memref<1x8x128xf32, #tpu.memory_space<vmem>>, vector<1x8x128xf32>,
    return
  }
  func.func @transform_0(%arg0: i32, %arg1: i32) -> (i32, i32, i32) {
    %c0_i32 = arith.constant 0 : i32
    %c0_i32_0 = arith.constant 0 : i32
    %c0_i32_1 = arith.constant 0 : i32
    return %arg0, %c0_i32, %c0_i32_0 : i32, i32, i32
  }
  func.func @transform_1(%arg0: i32, %arg1: i32) -> (i32, i32) {
    %c0_i32 = arith.constant 0 : i32
    %c0_i32_0 = arith.constant 0 : i32
    %c0_i32_1 = arith.constant 0 : i32
    return %c0_i32, %c0_i32_0 : i32, i32
  }
  func.func @transform_2(%arg0: i32, %arg1: i32) -> (i32, i32, i32) {
    %c0_i32 = arith.constant 0 : i32
    %c0_i32_0 = arith.constant 0 : i32
    %c0_i32_1 = arith.constant 0 : i32
    return %arg1, %c0_i32, %c0_i32_0 : i32, i32, i32
  }
  func.func @transform_3(%arg0: i32, %arg1: i32) -> (i32, i32, i32) {
    %c0_i32 = arith.constant 0 : i32
    %c0_i32_0 = arith.constant 0 : i32
    %c0_i32_1 = arith.constant 0 : i32
    return %arg1, %c0_i32, %c0_i32_0 : i32, i32, i32
  }
  func.func @transform_4(%arg0: i32, %arg1: i32) -> (i32, i32, i32) {
    %c0_i32 = arith.constant 0 : i32
    %c0_i32_0 = arith.constant 0 : i32
    %c0_i32_1 = arith.constant 0 : i32
    return %arg1, %c0_i32, %c0_i32_0 : i32, i32, i32
  }
  func.func @transform_5(%arg0: i32, %arg1: i32) -> (i32, i32, i32) {
    %c0_i32 = arith.constant 0 : i32
    %c0_i32_0 = arith.constant 0 : i32
    %c0_i32_1 = arith.constant 0 : i32
    return %arg1, %c0_i32, %c0_i32_0 : i32, i32, i32
  }
  func.func @transform_6(%arg0: i32, %arg1: i32) -> (i32, i32, i32) {
    %c0_i32 = arith.constant 0 : i32
    %c0_i32_0 = arith.constant 0 : i32
    %c0_i32_1 = arith.constant 0 : i32
    return %arg1, %c0_i32, %c0_i32_0 : i32, i32, i32
  }
  func.func @transform_7(%arg0: i32, %arg1: i32) -> (i32, i32, i32) {
    %c0_i32 = arith.constant 0 : i32
    %c0_i32_0 = arith.constant 0 : i32
    %c0_i32_1 = arith.constant 0 : i32
    return %arg0, %c0_i32, %c0_i32_0 : i32, i32, i32
  }
}

</mosaic_0001>

<bundles_post_ra>
// kernel: tpu_custom_call.1
= control target key start
LH: loop header
LB: loop body
LE: loop exit
PB: predicated region body
PF: predicated region fallthrough
CT: control target
= control target key end

     0   :  { %s4823_s0 = inlined_call_operand.hbm [shape: f32[2,8,128], index: 0, kind: input, shape index: {}]   ;;  %s4824_s1 = inlined_call_operand.hbm [shape: f32[8,8], index: 1, kind: input, shape index: {}]   ;;  %s4825_s2 = inlined_call_operand.hbm [shape: f32[2,8,1536], index: 2, kind: input, shape index: {}]   ;;  %s4826_s3 = inlined_call_operand.hbm [shape: bf16[2,128,1536], index: 3, kind: input, shape index: {}]   ;;  %s4827_s4 = inlined_call_operand.hbm [shape: bf16[2,512,128], index: 4, kind: input, shape index: {}]   ;;  %s4828_s5 = inlined_call_operand.hbm [shape: bf16[2,128,128], index: 5, kind: input, shape index: {}]   ;;  %s4829_s6 = inlined_call_operand.hbm [shape: bf16[2,128,128], index: 6, kind: input, shape index: {}]   ;;  %s4830_s7 = inlined_call_operand.hbm [shape: f32[2,8,128], index: 7, kind: output, shape index: {}]  }
   0x1   :  { %4838 = sst [smem:[#allocation25_spill]] %s4823_s0 }
   0x2   :  { %4839 = sst [smem:[#allocation26_spill]] %s4824_s1 }
   0x3   :  { %4840 = sst [smem:[#allocation27_spill]] %s4825_s2 }
   0x4   :  { %4841 = sst [smem:[#allocation28_spill]] %s4826_s3 }
   0x5   :  { %4842 = sst [smem:[#allocation29_spill]] %s4830_s7 }
   0x6   :  { %12 = vsyncpa [#allocation3], 0 }
   0x7   :  { %14 = vsyncpa [#allocation3 + $0x1], 0 }
   0x8   :  { %15 = vsyncpa [#allocation6], 0 }
   0x9   :  { %16 = vsyncpa [#allocation4], 0 }
   0xa   :  { %18 = vsyncpa [#allocation4 + $0x1], 0  ;;  %s4018_s24 = smov 0   ;;  %s4020_s25 = smov 0  }
   0xb   :  { %s4022_s26 = smov 0   ;;  %s4024_s27 = smov 0  }
   0xc   :  { %s4026_s28 = smov 0   ;;  %s4028_s29 = smov 0  }
   0xd   :  { %s4030_s30 = smov 0   ;;  %s4032_s8 = smov 0  }
   0xe   :  { %s4034_s9 = smov 0   ;;  %s4036_s10 = smov 0  }
   0xf   :  { %s4038_s11 = smov 0  }
  0x10 LB: > { %4843 = sst [smem:[#allocation17_spill]] %s3937_s26  ;;  %s2702_s12 = sadd.s32 4294967294, %s3969_s11   ;;  %s3969_s11 = sphi %s4038_s11, %s24_s11   ;;  %s3965_s10 = sphi %s4036_s10, %s4873_s10   ;;  %s3961_s9 = sphi %s4034_s9, %s4880_s9   ;;  %s3957_s8 = sphi %s4032_s8, %s4871_s8   ;;  %s3953_s30 = sphi %s4030_s30, %s4879_s30   ;;  %s3949_s29 = sphi %s4028_s29, %s4878_s29   ;;  %s3945_s28 = sphi %s4026_s28, %s4877_s28   ;;  %s3941_s27 = sphi %s4024_s27, %s4876_s27   ;;  %s3937_s26 = sphi %s4022_s26, %s4869_s26   ;;  %s3933_s25 = sphi %s4020_s25, %s4875_s25   ;;  %s3929_s24 = sphi %s4018_s24, %s4874_s24  }
  0x11   : > { %4844 = sst [smem:[#allocation18_spill]] %s3953_s30  ;;  %s33_s13 = sadd.s32 1, %s3961_s9 }
  0x12   : > { %4845 = sst [smem:[#allocation19_spill]] %s3957_s8  ;;  %p34_p0 = scmp.ge.s32.totalorder %s33_s13, 2 }
  0x13   : > { %4846 = sst [smem:[#allocation20_spill]] %s3965_s10  ;;  %s36_s14 = sadd.s32 1, %s3965_s10 }
  0x14   : > { %s43_s15 = sadd.s32 1, %s3949_s29  ;;  %p50_p1 = scmp.ne.s32.totalorder %s3949_s29, %s3945_s28 }
  0x15   : > { %s4882_s13 = smov (%p34_p0, %s33_s13), 0  ;;  %s4884_s14 = smov (!%p34_p0, %s36_s14), %s3965_s10 }
  0x16   : > { %4847 = sst [smem:[#allocation21_spill]] %s4882_s13  ;;  %p51_p2 = scmp.eq.s32.totalorder %s3969_s11, 0 }
  0x17   : > { %p56_p3 = scmp.ne.s32.totalorder %s3945_s28, %s3941_s27  ;;  %p38_p4 = scmp.ge.s32.totalorder %s4884_s14, 2 }
  0x18   : > { %s87_s16 = ssub.s32 %s3961_s9, %s4882_s13  ;;  %p4090_p5 = por %p51_p2, %p50_p1 }
  0x19   : > { %p88_p6 = scmp.eq.s32.totalorder %s87_s16, 0  ;;  %s4886_s14 = smov (%p38_p4, %s4884_s14), 0 }
  0x1a   : > { %4849 = sst [smem:[#allocation22_spill]] %s4886_s14  ;;  %s90_s18 = sadd.s32 1, %s3937_s26 }
  0x1b   : > { %p97_p7 = scmp.ne.s32.totalorder %s3937_s26, %s3933_s25  ;;  %s40_s19 = ssub.s32 %s3965_s10, %s4886_s14 }
  0x1c   : > { %p237_p8 = scmp.eq.s32.totalorder %s2702_s12, 3  ;;  %p41_p9 = scmp.eq.s32.totalorder %s40_s19, 0 }
  0x1d   : > { %p4101_p10 = por %p97_p7, %p51_p2  ;;  %p3510_p12 = scmp.lt.s32.totalorder %s3969_s11, 4 }
  0x1e   : > { %s4106_s21 = scalar_select %p88_p6, %s3937_s26, %s90_s18  }
  0x1f   : > { %s4109_s22 = scalar_select %p41_p9, %s3949_s29, %s43_s15  }
  0x20   : > { %4851 = sst [smem:[#allocation23_spill]] %s4106_s21  ;;  %p4114_p11 = por %p237_p8, %p56_p3 }
  0x21   : > { %4852 = sst [smem:[#allocation24_spill]] %s4109_s22  ;;  %s269_s12 = sand.u32 1, %s3969_s11  }
  0x22   : > { %s271_s16 = sand.u32 1, %s3949_s29   ;;  %s2707_s14 = sshll.u32 %s3965_s10, 3 }
  0x23   : > { %s2706_s19 = sshll.u32 %s271_s16, 3  ;;  %s4854_s0 = sld [smem:[#allocation25_spill]] }
  0x24   : > { %s273_s21 = scalar_lea.vmem [#allocation2], %s2706_s19  ;;  %p3487_p13 = pnand %p3510_p12, %p4090_p5 }
  0x25   : > { %s281_s30 = sshll.u32 %s273_s21, 4  ;;  %p4129_p0 = pnand %p3510_p12, %p4101_p10  ;;  %s282_s30 = int_to_ptr.vmem [resolvable:$true] %s281_s30 }
  0x26   : > { %s4134_s16 = sand.u32 1, %s3937_s26   ;;  %s3459_s7 = smul.u32 96, %s3961_s9 }
  0x27   : > { %s4137_s13 = scalar_lea.sflag [#allocation3], %s269_s12  ;;  %s4856_s2 = sld [smem:[#allocation27_spill]] }
  0x28   : > { %s3460_s19 = smul.u32 768, %s4134_s16  ;;  %s4857_s3 = sld [smem:[#allocation28_spill]] }
  0x29   : > { %s277_s8 = scalar_lea.hbm %s4854_s0, %s2707_s14  ;;  %s3461_s12 = smul.u32 768, %s3961_s9 }
  0x2a   : > { %s279_s18 = sshll.u32 %s277_s8, 4  ;;  %s3458_s8 = smul.u32 96, %s4134_s16  ;;  %s280_s18 = int_to_ptr.hbm [resolvable:$true] %s279_s18 }
  0x2b   : > { %3489 = dma.hbm_to_vmem [thread:$0]  (!%p3487_p13), %s280_s18, 128, %s282_s30, %s4137_s13  }
  0x2c   : > { %s292_s0 = scalar_lea.vmem [#allocation7], %s3458_s8  ;;  %s312_s26 = scalar_lea.vmem [#allocation8], %s3460_s19 }
  0x2d   : > { %s297_s20 = scalar_lea.hbm %s4856_s2, %s3459_s7  ;;  %s301_s10 = sshll.u32 %s292_s0, 4  ;;  %s302_s10 = int_to_ptr.vmem [resolvable:$true] %s301_s10 }
  0x2e   : > { %s299_s21 = sshll.u32 %s297_s20, 4  ;;  %s317_s18 = scalar_lea.hbm %s4857_s3, %s3461_s12  ;;  %s300_s21 = int_to_ptr.hbm [resolvable:$true] %s299_s21 }
  0x2f   : > { %3492 = dma.hbm_to_vmem [thread:$0]  (!%p4129_p0), %s300_s21, 1536, %s302_s10, %s4137_s13  }
  0x30   : > { %s320_s14 = sshll.u32 %s312_s26, 4  ;;  %s318_s7 = sshll.u32 %s317_s18, 4  ;;  %s321_s14 = int_to_ptr.vmem [resolvable:$true] %s320_s14  ;;  %s319_s7 = int_to_ptr.hbm [resolvable:$true] %s318_s7 }
  0x31   : > { %s2710_s17 = sshll.u32 %s4134_s16, 8  ;;  %s3971_s8 = smov 768  }
  0x32   : > { %s3972_s0 = smov 48   ;;  %s3311_s10 = sshll.u32 %s3961_s9, 8 }
  0x33   : > { %3495 = dma.hbm_to_vmem [thread:$0]  (!%p4129_p0), %s319_s7, 12288, %s321_s14, %s4137_s13, %s3971_s8, %s3971_s8, %s3972_s0  }
  0x34   : > { %s339_s22 = scalar_lea.hbm %s4827_s4, %s3311_s10  ;;  %s334_s19 = scalar_lea.vmem [#allocation9], %s2710_s17 }
  0x35   : > { %s342_s26 = sshll.u32 %s334_s19, 4  ;;  %s340_s12 = sshll.u32 %s339_s22, 4  ;;  %s343_s26 = int_to_ptr.vmem [resolvable:$true] %s342_s26  ;;  %s341_s12 = int_to_ptr.hbm [resolvable:$true] %s340_s12 }
  0x36   : > { %s2713_s30 = sshll.u32 %s4134_s16, 6  ;;  %s4836_s18 = smov 64  }
  0x37   : > { %s4837_s14 = smov 4   ;;  %s3312_s7 = sshll.u32 %s3961_s9, 6 }
  0x38   : > { %3498 = dma.hbm_to_vmem [thread:$0]  (!%p4129_p0), %s341_s12, 4096, %s343_s26, %s4137_s13, %s4836_s18, %s4836_s18, %s4837_s14  }
  0x39   : > { %s361_s0 = scalar_lea.hbm %s4828_s5, %s3312_s7  ;;  %s356_s10 = scalar_lea.vmem [#allocation10], %s2713_s30 }
  0x3a   : > { %s364_s20 = sshll.u32 %s356_s10, 4  ;;  %s362_s21 = sshll.u32 %s361_s0, 4  ;;  %s365_s20 = int_to_ptr.vmem [resolvable:$true] %s364_s20  ;;  %s363_s21 = int_to_ptr.hbm [resolvable:$true] %s362_s21 }
  0x3b   : > { %3501 = dma.hbm_to_vmem [thread:$0]  (!%p4129_p0), %s363_s21, 1024, %s365_s20, %s4137_s13, %s4836_s18, %s4836_s18, %s4837_s14  }
  0x3c   : > { %s4180_s22 = sadd.s32 4294967295, %s3969_s11   ;;  %p103_p4 = scmp.ne.s32.totalorder %s3933_s25, %s3929_s24 }
  0x3d   : > { %p57_p2 = scmp.eq.s32.totalorder %s4180_s22, 0  ;;  %p231_p5 = scmp.eq.s32.totalorder %s4180_s22, 3 }
  0x3e   : > { %p2703_p6 = scmp.ge.s32.totalorder %s3969_s11, 1  ;;  %p244_p10 = scmp.lt.s32.totalorder %s3969_s11, 5 }
  0x3f   : > { %p4192_p7 = por %p57_p2, %p56_p3  ;;  %p4198_p8 = por %p103_p4, %p57_p2 }
  0x40   : > { %p4205_p9 = por %p231_p5, %p50_p1  ;;  %s4861_s1 = sld [smem:[#allocation26_spill]] }
  0x41   : > { %p4213_p3 = pnand %p2703_p6, %p244_p10  ;;  %s3975_s10 = smov [#allocation5]  }
  0x42   : > { %s258_s20 = sshll.u32 %s3975_s10, 4  ;;  %s383_s14 = scalar_lea.hbm %s4829_s6, %s3312_s7  ;;  %s259_s20 = int_to_ptr.vmem [resolvable:$true] %s258_s20 }
  0x43   : > { %p3482_p12 = pneg %p4213_p3  ;;  %s384_s24 = sshll.u32 %s383_s14, 4  ;;  %s385_s24 = int_to_ptr.hbm [resolvable:$true] %s384_s24 }
  0x44   : > { %s378_s17 = scalar_lea.vmem [#allocation11], %s2713_s30  ;;  %s4863_s2 = smov 4  }
  0x45   : > { %p3483_p1 = pnand %p3482_p12, %p57_p2  ;;  %s4864_s3 = smov 64  }
  0x46   : > { %s256_s8 = sshll.u32 %s4861_s1, 4  ;;  %s386_s1 = sshll.u32 %s378_s17, 4  ;;  %s257_s8 = int_to_ptr.hbm [resolvable:$true] %s256_s8  ;;  %s387_s1 = int_to_ptr.vmem [resolvable:$true] %s386_s1 }
  0x47   : > { %3485 = dma.hbm_to_vmem [thread:$0]  (!%p3483_p1), %s257_s8, 128, %s259_s20, [#allocation6]  }
  0x48   : > { %3504 = dma.hbm_to_vmem [thread:$0]  (!%p4129_p0), %s385_s24, 1024, %s387_s1, %s4137_s13, %s4864_s3, %s4864_s3, %s4863_s2  }
  0x49   : > { %398 = sbr.rel (%p4213_p3) target bundleno = 1593 (0x639), region = 48  ;;  %s400_s18 = sand.u32 (!%p4213_p3), 1, %s4180_s22  }
  0x4a   : > { %s402_s14 = sand.u32 (!%p4213_p3), 1, %s3945_s28   ;;  %s401_s30 = scalar_lea.sflag (!%p4213_p3), [#allocation3], %s400_s18 }
  0x4b   : > { %s2720_s16 = sshll.u32 (!%p4213_p3), %s402_s14, 3 }
  0x4c   : > { %s404_s7 = scalar_lea.vmem (!%p4213_p3), [#allocation2], %s2720_s16 }
  0x4e   : > { %3912 = dma.done.wait (%p4192_p7), %s401_s30, 128  }
  0x4f   : > { %3914 = vsyncadd (%p4192_p7), %s401_s30, 4294967168 }
  0x50   : > { %3916 = dma.done.wait (%p57_p2), [#allocation6], 128  }
  0x51   : > { %3918 = vsyncadd (%p57_p2), [#allocation6], 4294967168  ;;  %s417_s1 = sand.u32 1, %s3933_s25  }
  0x52   : > { %s3462_s2 = smul.u32 96, %s417_s1 }
  0x54   : > { %s4247_s3 = scalar_lea.vmem [#allocation7], %s3462_s2 }
  0x55   : > { %3920 = dma.done.wait (%p4198_p8), %s401_s30, 19968  }
  0x56   : > { %3922 = vsyncadd (%p4198_p8), %s401_s30, 4294947328  ;;  %s3463_s15 = smul.u32 768, %s417_s1  ;;  %s2722_s13 = sshll.u32 %s417_s1, 8 }
  0x57   : > { %s2723_s19 = sshll.u32 %s417_s1, 6  ;;  %s4255_s0 = scalar_lea.vmem [#allocation9], %s2722_s13 }
  0x58   : > { %s4253_s8 = scalar_lea.vmem [#allocation8], %s3463_s15  ;;  %s4257_s22 = scalar_lea.vmem [#allocation10], %s2723_s19 }
  0x59   : > { %s4259_s10 = scalar_lea.vmem [#allocation11], %s2723_s19  ;;  %s4261_s20 = scalar_lea.vmem [#allocation12], %s2720_s16 }
  0x5a   : > { %s4865_s21 = sld [smem:[#allocation18_spill]] }
  0x60   : > { %p2726_p13 = scmp.ne.s32.totalorder %s4865_s21, 0 }
  0x62   : > { %520 = sbr.rel (%p2726_p13) target bundleno = 105 (0x69), region = 80 }
  0x67   : > { %v521_v0 = vld [vmem:[%s404_s7] sm:$0xff] }
  0x68   : > { %522 = vst [vmem:[%s4261_s20] sm:$0xff] %v521_v0 }
  0x69 PF: > { %v3065_v2 = vld [vmem:[%s4253_s8 + $0x2a0] sm:$0xf]  ;;  %v3404_v3 = vld [vmem:[%s4253_s8 + $0x2cc] sm:$0xf0]  ;;  %v3398_v5 = vld [vmem:[%s4253_s8 + $0x2a4] sm:$0xf] }
  0x6a   : > { %v3066_v4 = vor.u32 %v3404_v3, %v3065_v2  ;;  %v3067_v6 = vld [vmem:[%s4253_s8 + $0x2d0] sm:$0xf0]  ;;  %v3073_v7 = vld [vmem:[%s4253_s8 + $0x2a8] sm:$0xf]  ;;  %v3405_v9 = vld [vmem:[%s4253_s8 + $0x2d4] sm:$0xf0] }
  0x6b   : > { %v3070_v8 = vor.u32 %v3398_v5, %v3067_v6  ;;  %v3399_v10 = vld [vmem:[%s4253_s8 + $0x2ac] sm:$0xf]  ;;  %v3075_v11 = vld [vmem:[%s4253_s8 + $0x2d8] sm:$0xf0]  ;;  %v3074_v12 = vor.u32 %v3405_v9, %v3073_v7  ;;  %v3017_v14 = vld [vmem:[%s4253_s8 + $0x240] sm:$0xf] }
  0x6c   : > { %1248 = vmatpush.bf16.msra.mxu0 %v3066_v4  ;;  %v3078_v13 = vor.u32 %v3399_v10, %v3075_v11  ;;  %v3392_v15 = vld [vmem:[%s4253_s8 + $0x26c] sm:$0xf0]  ;;  %v3386_v16 = vld [vmem:[%s4253_s8 + $0x244] sm:$0xf]  ;;  %v3019_v18 = vld [vmem:[%s4253_s8 + $0x270] sm:$0xf0] }
  0x6d   : > { %1261 = vmatpush.bf16.msra.mxu1 %v3070_v8  ;;  %v3018_v17 = vor.u32 %v3392_v15, %v3017_v14  ;;  %v3025_v19 = vld [vmem:[%s4253_s8 + $0x248] sm:$0xf]  ;;  %v3393_v20 = vld [vmem:[%s4253_s8 + $0x274] sm:$0xf0]  ;;  %1274 = vmatpush.bf16.msra.mxu2 %v3074_v12  ;;  %v3022_v22 = vor.u32 %v3386_v16, %v3019_v18  ;;  %v3387_v24 = vld [vmem:[%s4253_s8 + $0x24c] sm:$0xf] }
  0x6e   : > { %1287 = vmatpush.bf16.msra.mxu3 %v3078_v13  ;;  %v3026_v23 = vor.u32 %v3393_v20, %v3025_v19  ;;  %v3027_v25 = vld [vmem:[%s4253_s8 + $0x278] sm:$0xf0]  ;;  %v2969_v26 = vld [vmem:[%s4253_s8 + $0x1e0] sm:$0xf]  ;;  %v3380_v28 = vld [vmem:[%s4253_s8 + $0x20c] sm:$0xf0] }
  0x6f   : > { %v4266_v1 = vld [vmem:[%s4261_s20] sm:$0xff]  ;;  %v3030_v27 = vor.u32 %v3387_v24, %v3027_v25  ;;  %v2971_v30 = vld [vmem:[%s4253_s8 + $0x210] sm:$0xf0]  ;;  %v2970_v31 = vor.u32 %v3380_v28, %v2969_v26  ;;  %v3381_v33 = vld [vmem:[%s4253_s8 + $0x214] sm:$0xf0]  ;;  %vm1405_vm3 = vcmask 1047556  }
  0x70   : > { %728 = vadd.xlane.f32.xlu0 %v4266_v1  ;;  %v731_v21 = vmul.f32 %v4266_v1, %v4266_v1  ;;  %v3374_v29 = vld [vmem:[%s4253_s8 + $0x1e4] sm:$0xf]  ;;  %1249 = vmatpush.bf16.msra.mxu0 %v3018_v17  ;;  %v2977_v32 = vld [vmem:[%s4253_s8 + $0x1e8] sm:$0xf]  ;;  %v3375_v34 = vld [vmem:[%s4253_s8 + $0x1ec] sm:$0xf] }
  0x71   : > { %1262 = vmatpush.bf16.msra.mxu1 %v3022_v22  ;;  %v2974_v35 = vor.u32 %v3374_v29, %v2971_v30  ;;  %v2979_v36 = vld [vmem:[%s4253_s8 + $0x218] sm:$0xf0]  ;;  %v2921_v37 = vld [vmem:[%s4253_s8 + $0x180] sm:$0xf]  ;;  %v3368_v38 = vld [vmem:[%s4253_s8 + $0x1ac] sm:$0xf0]  ;;  %1275 = vmatpush.bf16.msra.mxu2 %v3026_v23  ;;  %v2978_v39 = vor.u32 %v3381_v33, %v2977_v32 }
  0x72   : > { %v3362_v40 = vld [vmem:[%s4253_s8 + $0x184] sm:$0xf]  ;;  %v2923_v41 = vld [vmem:[%s4253_s8 + $0x1b0] sm:$0xf0]  ;;  %1288 = vmatpush.bf16.msra.mxu3 %v3030_v27  ;;  %v2982_v42 = vor.u32 %v3375_v34, %v2979_v36  ;;  %v2929_v43 = vld [vmem:[%s4253_s8 + $0x188] sm:$0xf]  ;;  %v2922_v45 = vor.u32 %v3368_v38, %v2921_v37 }
  0x73   : > { %v3369_v44 = vld [vmem:[%s4253_s8 + $0x1b4] sm:$0xf0]  ;;  %v3363_v46 = vld [vmem:[%s4253_s8 + $0x18c] sm:$0xf]  ;;  %v2931_v47 = vld [vmem:[%s4253_s8 + $0x1b8] sm:$0xf0]  ;;  %v2926_v48 = vor.u32 %v3362_v40, %v2923_v41 }
  0x74   : > { %1250 = vmatpush.bf16.msra.mxu0 %v2970_v31  ;;  %v2930_v49 = vor.u32 %v3369_v44, %v2929_v43  ;;  %v2934_v50 = vor.u32 %v3363_v46, %v2931_v47  ;;  %v2873_v51 = vld [vmem:[%s4253_s8 + $0x120] sm:$0xf]  ;;  %v3356_v52 = vld [vmem:[%s4253_s8 + $0x14c] sm:$0xf0]  ;;  %v3350_v53 = vld [vmem:[%s4253_s8 + $0x124] sm:$0xf] }
  0x75   : > { %1263 = vmatpush.bf16.msra.mxu1 %v2974_v35  ;;  %1276 = vmatpush.bf16.msra.mxu2 %v2978_v39  ;;  %v2874_v54 = vor.u32 %v3356_v52, %v2873_v51  ;;  %v2875_v55 = vld [vmem:[%s4253_s8 + $0x150] sm:$0xf0]  ;;  %v2881_v56 = vld [vmem:[%s4253_s8 + $0x128] sm:$0xf]  ;;  %v3357_v57 = vld [vmem:[%s4253_s8 + $0x154] sm:$0xf0] }
  0x76   : > { %1289 = vmatpush.bf16.msra.mxu3 %v2982_v42  ;;  %v2878_v58 = vor.u32 %v3350_v53, %v2875_v55  ;;  %v2882_v59 = vor.u32 %v3357_v57, %v2881_v56  ;;  %v3351_v60 = vld [vmem:[%s4253_s8 + $0x12c] sm:$0xf]  ;;  %v2883_v61 = vld [vmem:[%s4253_s8 + $0x158] sm:$0xf0]  ;;  %v2825_v63 = vld [vmem:[%s4253_s8 + $0xc0] sm:$0xf] }
  0x77   : > { %v2886_v62 = vor.u32 %v3351_v60, %v2883_v61  ;;  %v3344_v0 = vld [vmem:[%s4253_s8 + $0xec] sm:$0xf0]  ;;  %v3338_v2 = vld [vmem:[%s4253_s8 + $0xc4] sm:$0xf]  ;;  %v2827_v4 = vld [vmem:[%s4253_s8 + $0xf0] sm:$0xf0] }
  0x78   : > { %732 = vadd.xlane.f32.xlu0 %v731_v21  ;;  %1251 = vmatpush.bf16.msra.mxu0 %v2922_v45  ;;  %v2826_v3 = vor.u32 %v3344_v0, %v2825_v63  ;;  %v2833_v5 = vld [vmem:[%s4253_s8 + $0xc8] sm:$0xf]  ;;  %v3345_v6 = vld [vmem:[%s4253_s8 + $0xf4] sm:$0xf0]  ;;  %v2830_v7 = vor.u32 %v3338_v2, %v2827_v4  ;;  %v3339_v9 = vld [vmem:[%s4253_s8 + $0xcc] sm:$0xf] }
  0x79   : > { %1264 = vmatpush.bf16.msra.mxu1 %v2926_v48  ;;  %1277 = vmatpush.bf16.msra.mxu2 %v2930_v49  ;;  %v2834_v8 = vor.u32 %v3345_v6, %v2833_v5  ;;  %v2835_v10 = vld [vmem:[%s4253_s8 + $0xf8] sm:$0xf0]  ;;  %v2777_v12 = vld [vmem:[%s4253_s8 + $0x60] sm:$0xf]  ;;  %v3332_v13 = vld [vmem:[%s4253_s8 + $0x8c] sm:$0xf0] }
  0x7a   : > { %1290 = vmatpush.bf16.msra.mxu3 %v2934_v50  ;;  %v2838_v11 = vor.u32 %v3339_v9, %v2835_v10  ;;  %v3326_v14 = vld [vmem:[%s4253_s8 + $0x64] sm:$0xf]  ;;  %v2778_v15 = vor.u32 %v3332_v13, %v2777_v12  ;;  %v2779_v16 = vld [vmem:[%s4253_s8 + $0x90] sm:$0xf0]  ;;  %v2785_v17 = vld [vmem:[%s4253_s8 + $0x68] sm:$0xf] }
  0x7b   : > { %v3333_v18 = vld [vmem:[%s4253_s8 + $0x94] sm:$0xf0]  ;;  %v2782_v19 = vor.u32 %v3326_v14, %v2779_v16  ;;  %v3327_v21 = vld [vmem:[%s4253_s8 + $0x6c] sm:$0xf]  ;;  %v2787_v22 = vld [vmem:[%s4253_s8 + $0x98] sm:$0xf0] }
  0x7c   : > { %1252 = vmatpush.bf16.msra.mxu0 %v2874_v54  ;;  %v2786_v20 = vor.u32 %v3333_v18, %v2785_v17  ;;  %v2790_v23 = vor.u32 %v3327_v21, %v2787_v22  ;;  %v2729_v24 = vld [vmem:[%s4253_s8] sm:$0xf]  ;;  %v3320_v25 = vld [vmem:[%s4253_s8 + $0x2c] sm:$0xf0]  ;;  %v3314_v26 = vld [vmem:[%s4253_s8 + $0x4] sm:$0xf] }
  0x7d   : > { %1265 = vmatpush.bf16.msra.mxu1 %v2878_v58  ;;  %1278 = vmatpush.bf16.msra.mxu2 %v2882_v59  ;;  %v2730_v27 = vor.u32 %v3320_v25, %v2729_v24  ;;  %v2731_v28 = vld [vmem:[%s4253_s8 + $0x30] sm:$0xf0]  ;;  %v2737_v29 = vld [vmem:[%s4253_s8 + $0x8] sm:$0xf]  ;;  %v3321_v30 = vld [vmem:[%s4253_s8 + $0x34] sm:$0xf0] }
  0x7e   : > { %1291 = vmatpush.bf16.msra.mxu3 %v2886_v62  ;;  %v2734_v31 = vor.u32 %v3314_v26, %v2731_v28  ;;  %v2738_v32 = vor.u32 %v3321_v30, %v2737_v29  ;;  %v3315_v33 = vld [vmem:[%s4253_s8 + $0xc] sm:$0xf]  ;;  %v2739_v34 = vld [vmem:[%s4253_s8 + $0x38] sm:$0xf0]  ;;  %v3081_v35 = vld [vmem:[%s4253_s8 + $0x2b0] sm:$0xf] }
  0x7f   : > { %v2742_v36 = vor.u32 %v3315_v33, %v2739_v34  ;;  %v3406_v37 = vld [vmem:[%s4253_s8 + $0x2dc] sm:$0xf0]  ;;  %v3400_v38 = vld [vmem:[%s4253_s8 + $0x2b4] sm:$0xf]  ;;  %v3083_v39 = vld [vmem:[%s4253_s8 + $0x2e0] sm:$0xf0] }
  0x80   : > { %1253 = vmatpush.bf16.msra.mxu0 %v2826_v3  ;;  %v3082_v40 = vor.u32 %v3406_v37, %v3081_v35  ;;  %v3086_v41 = vor.u32 %v3400_v38, %v3083_v39  ;;  %v3089_v42 = vld [vmem:[%s4253_s8 + $0x2b8] sm:$0xf]  ;;  %v3407_v43 = vld [vmem:[%s4253_s8 + $0x2e4] sm:$0xf0]  ;;  %v3401_v44 = vld [vmem:[%s4253_s8 + $0x2bc] sm:$0xf] }
  0x81   : > { %1266 = vmatpush.bf16.msra.mxu1 %v2830_v7  ;;  %1279 = vmatpush.bf16.msra.mxu2 %v2834_v8  ;;  %v3090_v45 = vor.u32 %v3407_v43, %v3089_v42  ;;  %v3091_v46 = vld [vmem:[%s4253_s8 + $0x2e8] sm:$0xf0]  ;;  %v3033_v47 = vld [vmem:[%s4253_s8 + $0x250] sm:$0xf]  ;;  %v3394_v48 = vld [vmem:[%s4253_s8 + $0x27c] sm:$0xf0] }
  0x82   : > { %1292 = vmatpush.bf16.msra.mxu3 %v2838_v11  ;;  %v3094_v49 = vor.u32 %v3401_v44, %v3091_v46  ;;  %v3034_v50 = vor.u32 %v3394_v48, %v3033_v47  ;;  %v3388_v51 = vld [vmem:[%s4253_s8 + $0x254] sm:$0xf]  ;;  %v3035_v52 = vld [vmem:[%s4253_s8 + $0x280] sm:$0xf0]  ;;  %v3041_v53 = vld [vmem:[%s4253_s8 + $0x258] sm:$0xf] }
  0x83   : > { %v3038_v54 = vor.u32 %v3388_v51, %v3035_v52  ;;  %v3395_v55 = vld [vmem:[%s4253_s8 + $0x284] sm:$0xf0]  ;;  %v3389_v56 = vld [vmem:[%s4253_s8 + $0x25c] sm:$0xf]  ;;  %v3043_v57 = vld [vmem:[%s4253_s8 + $0x288] sm:$0xf0] }
  0x84   : > { %1254 = vmatpush.bf16.msra.mxu0 %v2778_v15  ;;  %v3042_v58 = vor.u32 %v3395_v55, %v3041_v53  ;;  %v3046_v59 = vor.u32 %v3389_v56, %v3043_v57  ;;  %v2985_v60 = vld [vmem:[%s4253_s8 + $0x1f0] sm:$0xf]  ;;  %v3382_v61 = vld [vmem:[%s4253_s8 + $0x21c] sm:$0xf0]  ;;  %v3376_v62 = vld [vmem:[%s4253_s8 + $0x1f4] sm:$0xf] }
  0x85   : > { %1267 = vmatpush.bf16.msra.mxu1 %v2782_v19  ;;  %1280 = vmatpush.bf16.msra.mxu2 %v2786_v20  ;;  %v2986_v63 = vor.u32 %v3382_v61, %v2985_v60  ;;  %v2987_v0 = vld [vmem:[%s4253_s8 + $0x220] sm:$0xf0]  ;;  %v2993_v2 = vld [vmem:[%s4253_s8 + $0x1f8] sm:$0xf]  ;;  %v3383_v3 = vld [vmem:[%s4253_s8 + $0x224] sm:$0xf0] }
  0x86   : > { %1293 = vmatpush.bf16.msra.mxu3 %v2790_v23  ;;  %v2990_v4 = vor.u32 %v3376_v62, %v2987_v0  ;;  %v2994_v5 = vor.u32 %v3383_v3, %v2993_v2  ;;  %v3377_v6 = vld [vmem:[%s4253_s8 + $0x1fc] sm:$0xf]  ;;  %v2995_v7 = vld [vmem:[%s4253_s8 + $0x228] sm:$0xf0]  ;;  %v2937_v9 = vld [vmem:[%s4253_s8 + $0x190] sm:$0xf] }
  0x87   : > { %v2998_v8 = vor.u32 %v3377_v6, %v2995_v7  ;;  %v3370_v10 = vld [vmem:[%s4253_s8 + $0x1bc] sm:$0xf0]  ;;  %v3364_v11 = vld [vmem:[%s4253_s8 + $0x194] sm:$0xf]  ;;  %v2939_v13 = vld [vmem:[%s4253_s8 + $0x1c0] sm:$0xf0] }
  0x88   : > { %1255 = vmatpush.bf16.msra.mxu0 %v2730_v27  ;;  %v2938_v12 = vor.u32 %v3370_v10, %v2937_v9  ;;  %v2945_v14 = vld [vmem:[%s4253_s8 + $0x198] sm:$0xf]  ;;  %v3371_v15 = vld [vmem:[%s4253_s8 + $0x1c4] sm:$0xf0]  ;;  %v2942_v16 = vor.u32 %v3364_v11, %v2939_v13  ;;  %v3365_v18 = vld [vmem:[%s4253_s8 + $0x19c] sm:$0xf] }
  0x89   : > { %1268 = vmatpush.bf16.msra.mxu1 %v2734_v31  ;;  %1281 = vmatpush.bf16.msra.mxu2 %v2738_v32  ;;  %v2946_v17 = vor.u32 %v3371_v15, %v2945_v14  ;;  %v2947_v19 = vld [vmem:[%s4253_s8 + $0x1c8] sm:$0xf0]  ;;  %v2889_v21 = vld [vmem:[%s4253_s8 + $0x130] sm:$0xf]  ;;  %v3358_v22 = vld [vmem:[%s4253_s8 + $0x15c] sm:$0xf0] }
  0x8a   : > { %1294 = vmatpush.bf16.msra.mxu3 %v2742_v36  ;;  %v2950_v20 = vor.u32 %v3365_v18, %v2947_v19  ;;  %v3352_v23 = vld [vmem:[%s4253_s8 + $0x134] sm:$0xf]  ;;  %v2890_v24 = vor.u32 %v3358_v22, %v2889_v21  ;;  %v2891_v25 = vld [vmem:[%s4253_s8 + $0x160] sm:$0xf0]  ;;  %v2897_v26 = vld [vmem:[%s4253_s8 + $0x138] sm:$0xf] }
  0x8b   : > { %v3359_v27 = vld [vmem:[%s4253_s8 + $0x164] sm:$0xf0]  ;;  %v2894_v28 = vor.u32 %v3352_v23, %v2891_v25  ;;  %v3353_v30 = vld [vmem:[%s4253_s8 + $0x13c] sm:$0xf]  ;;  %v2899_v31 = vld [vmem:[%s4253_s8 + $0x168] sm:$0xf0] }
  0x8c   : > { %1300 = vmatpush.bf16.msrb.mxu0 %v3082_v40  ;;  %v2898_v29 = vor.u32 %v3359_v27, %v2897_v26  ;;  %v2902_v32 = vor.u32 %v3353_v30, %v2899_v31  ;;  %v2841_v34 = vld [vmem:[%s4253_s8 + $0xd0] sm:$0xf]  ;;  %v3346_v35 = vld [vmem:[%s4253_s8 + $0xfc] sm:$0xf0]  ;;  %v3340_v36 = vld [vmem:[%s4253_s8 + $0xd4] sm:$0xf] }
  0x8d   : > { %1313 = vmatpush.bf16.msrb.mxu1 %v3086_v41  ;;  %1326 = vmatpush.bf16.msrb.mxu2 %v3090_v45  ;;  %v2842_v37 = vor.u32 %v3346_v35, %v2841_v34  ;;  %v2843_v38 = vld [vmem:[%s4253_s8 + $0x100] sm:$0xf0]  ;;  %v2849_v39 = vld [vmem:[%s4253_s8 + $0xd8] sm:$0xf]  ;;  %v3347_v41 = vld [vmem:[%s4253_s8 + $0x104] sm:$0xf0] }
  0x8e   : > { %1339 = vmatpush.bf16.msrb.mxu3 %v3094_v49  ;;  %v2846_v40 = vor.u32 %v3340_v36, %v2843_v38  ;;  %v3341_v42 = vld [vmem:[%s4253_s8 + $0xdc] sm:$0xf]  ;;  %v2851_v43 = vld [vmem:[%s4253_s8 + $0x108] sm:$0xf0]  ;;  %v2850_v45 = vor.u32 %v3347_v41, %v2849_v39  ;;  %v2793_v47 = vld [vmem:[%s4253_s8 + $0x70] sm:$0xf] }
  0x8f   : > { %v2854_v46 = vor.u32 %v3341_v42, %v2851_v43  ;;  %v3334_v48 = vld [vmem:[%s4253_s8 + $0x9c] sm:$0xf0]  ;;  %v3328_v49 = vld [vmem:[%s4253_s8 + $0x74] sm:$0xf]  ;;  %v2795_v51 = vld [vmem:[%s4253_s8 + $0xa0] sm:$0xf0] }
  0x90   : > { %1301 = vmatpush.bf16.msrb.mxu0 %v3034_v50  ;;  %v2794_v50 = vor.u32 %v3334_v48, %v2793_v47  ;;  %v2801_v52 = vld [vmem:[%s4253_s8 + $0x78] sm:$0xf]  ;;  %v3335_v53 = vld [vmem:[%s4253_s8 + $0xa4] sm:$0xf0]  ;;  %v3329_v56 = vld [vmem:[%s4253_s8 + $0x7c] sm:$0xf] }
  0x91   : > { %1314 = vmatpush.bf16.msrb.mxu1 %v3038_v54  ;;  %1327 = vmatpush.bf16.msrb.mxu2 %v3042_v58  ;;  %v2798_v54 = vor.u32 %v3328_v49, %v2795_v51  ;;  %v2802_v55 = vor.u32 %v3335_v53, %v2801_v52  ;;  %v2803_v57 = vld [vmem:[%s4253_s8 + $0xa8] sm:$0xf0]  ;;  %v2745_v62 = vld [vmem:[%s4253_s8 + $0x10] sm:$0xf]  ;;  %v3316_v2 = vld [vmem:[%s4253_s8 + $0x14] sm:$0xf] }
  0x92   : > { %1340 = vmatpush.bf16.msrb.mxu3 %v3046_v59  ;;  %v2806_v58 = vor.u32 %v3329_v56, %v2803_v57  ;;  %v2747_v3 = vld [vmem:[%s4253_s8 + $0x40] sm:$0xf0]  ;;  %v3323_v7 = vld [vmem:[%s4253_s8 + $0x44] sm:$0xf0]  ;;  %v2755_v9 = vld [vmem:[%s4253_s8 + $0x48] sm:$0xf0] }
  0x93   : > { %v2750_v6 = vor.u32 %v3316_v2, %v2747_v3  ;;  %v4400_v18 = vld [vmem:[%s4247_s3] sm:$0xff]  ;;  %v3099_v30 = vld [vmem:[%s4253_s8 + $0x2f0] sm:$0xf0]  ;;  %v3105_v31 = vld [vmem:[%s4253_s8 + $0x2c8] sm:$0xf]  ;;  %vm1904_vm4 = vcmask 1043456  }
  0x94   : > { %1302 = vmatpush.bf16.msrb.mxu0 %v2986_v63  ;;  %v3322_v63 = vld [vmem:[%s4253_s8 + $0x3c] sm:$0xf0]  ;;  %v751_v22 = vperm.slane %v4400_v18, 0  ;;  %v3107_v34 = vld [vmem:[%s4253_s8 + $0x2f8] sm:$0xf0]  ;;  %vm1796_vm5 = vcmask 64512  }
  0x95   : > { %1315 = vmatpush.bf16.msrb.mxu1 %v2990_v4  ;;  %1328 = vmatpush.bf16.msrb.mxu2 %v2994_v5  ;;  %v2746_v0 = vor.u32 %v3322_v63, %v2745_v62  ;;  %v2753_v4 = vld [vmem:[%s4253_s8 + $0x18] sm:$0xf]  ;;  %v3097_v27 = vld [vmem:[%s4253_s8 + $0x2c0] sm:$0xf]  ;;  %v3396_v39 = vld [vmem:[%s4253_s8 + $0x28c] sm:$0xf0] }
  0x96   : > { %1341 = vmatpush.bf16.msrb.mxu3 %v2998_v8  ;;  %v3317_v8 = vld [vmem:[%s4253_s8 + $0x1c] sm:$0xf]  ;;  %v2754_v10 = vor.u32 %v3323_v7, %v2753_v4  ;;  %v3049_v38 = vld [vmem:[%s4253_s8 + $0x260] sm:$0xf]  ;;  %v3390_v42 = vld [vmem:[%s4253_s8 + $0x264] sm:$0xf] }
  0x97   : > { %v2758_v11 = vor.u32 %v3317_v8, %v2755_v9  ;;  %v3051_v43 = vld [vmem:[%s4253_s8 + $0x290] sm:$0xf0]  ;;  %v3059_v47 = vld [vmem:[%s4253_s8 + $0x298] sm:$0xf0]  ;;  %v3050_v48 = vor.u32 %v3396_v39, %v3049_v38  ;;  %v3384_v51 = vld [vmem:[%s4253_s8 + $0x22c] sm:$0xf0] }
  0x98   : > { %1303 = vmatpush.bf16.msrb.mxu0 %v2938_v12  ;;  %v3054_v49 = vor.u32 %v3390_v42, %v3051_v43  ;;  %v3009_v56 = vld [vmem:[%s4253_s8 + $0x208] sm:$0xf]  ;;  %v3385_v57 = vld [vmem:[%s4253_s8 + $0x234] sm:$0xf0]  ;;  %v2953_v62 = vld [vmem:[%s4253_s8 + $0x1a0] sm:$0xf] }
  0x99   : > { %1316 = vmatpush.bf16.msrb.mxu1 %v2942_v16  ;;  %1329 = vmatpush.bf16.msrb.mxu2 %v2946_v17  ;;  %v3372_v63 = vld [vmem:[%s4253_s8 + $0x1cc] sm:$0xf0]  ;;  %v3366_v3 = vld [vmem:[%s4253_s8 + $0x1a4] sm:$0xf]  ;;  %v2955_v4 = vld [vmem:[%s4253_s8 + $0x1d0] sm:$0xf0] }
  0x9a   : > { %1342 = vmatpush.bf16.msrb.mxu3 %v2950_v20  ;;  %v3367_v7 = vld [vmem:[%s4253_s8 + $0x1ac] sm:$0xf]  ;;  %v2963_v8 = vld [vmem:[%s4253_s8 + $0x1d8] sm:$0xf0]  ;;  %v2954_v9 = vor.u32 %v3372_v63, %v2953_v62  ;;  %v3336_v38 = vld [vmem:[%s4253_s8 + $0xac] sm:$0xf0] }
  0x9b   : > { %v2811_v42 = vld [vmem:[%s4253_s8 + $0xb0] sm:$0xf0]  ;;  %v2817_v43 = vld [vmem:[%s4253_s8 + $0x88] sm:$0xf]  ;;  %s4866_s26 = sld [smem:[#allocation19_spill]]  ;;  %s2507_s7 = sshll.u32 %s4261_s20, 4  ;;  %s2508_s7 = int_to_ptr.vmem [resolvable:$true] %s2507_s7 }
  0x9c   : > { %1304 = vmatpush.bf16.msrb.mxu0 %v2890_v24  ;;  %v753_v24 = vperm.slane %v4400_v18, 1  ;;  %v525_v63 = vld [vmem:[%s4247_s3 + $0x8] sm:$0xff]  ;;  %s4867_s16 = sld [smem:[#allocation29_spill]]  ;;  %s2495_s2 = scalar_lea.sflag [#allocation4], %s402_s14 }
  0x9d   : > { %1317 = vmatpush.bf16.msrb.mxu1 %v2894_v28  ;;  %1330 = vmatpush.bf16.msrb.mxu2 %v2898_v29  ;;  %v3408_v28 = vld [vmem:[%s4253_s8 + $0x2ec] sm:$0xf0]  ;;  %v3402_v29 = vld [vmem:[%s4253_s8 + $0x2c4] sm:$0xf] }
  0x9e   : > { %1343 = vmatpush.bf16.msrb.mxu3 %v2902_v32  ;;  %v3098_v36 = vor.u32 %v3408_v28, %v3097_v27  ;;  %v3342_v28 = vld [vmem:[%s4253_s8 + $0xe4] sm:$0xf] }
  0xa0   : > { %1305 = vmatpush.bf16.msrb.mxu0 %v2842_v37  ;;  %v3102_v37 = vor.u32 %v3402_v29, %v3099_v30  ;;  %v2859_v29 = vld [vmem:[%s4253_s8 + $0x110] sm:$0xf0]  ;;  %v2865_v30 = vld [vmem:[%s4253_s8 + $0xe8] sm:$0xf] }
  0xa1   : > { %1318 = vmatpush.bf16.msrb.mxu1 %v2846_v40  ;;  %1331 = vmatpush.bf16.msrb.mxu2 %v2850_v45  ;;  %v3397_v45 = vld [vmem:[%s4253_s8 + $0x294] sm:$0xf0]  ;;  %s3308_s24 = sshll.u32 %s4866_s26, 3 }
  0xa2   : > { %1344 = vmatpush.bf16.msrb.mxu3 %v2854_v46  ;;  %v3391_v46 = vld [vmem:[%s4253_s8 + $0x26c] sm:$0xf]  ;;  %s2505_s30 = scalar_lea.hbm %s4867_s16, %s3308_s24 }
  0xa3   : > { %v3062_v53 = vor.u32 %v3391_v46, %v3059_v47  ;;  %v2819_v46 = vld [vmem:[%s4253_s8 + $0xb8] sm:$0xf0]  ;;  %s2509_s1 = sshll.u32 %s2505_s30, 4  ;;  %s2510_s1 = int_to_ptr.hbm [resolvable:$true] %s2509_s1 }
  0xa4   : > { %1306 = vmatpush.bf16.msrb.mxu0 %v2794_v50  ;;  %v3001_v50 = vld [vmem:[%s4253_s8 + $0x200] sm:$0xf] }
  0xa5   : > { %1319 = vmatpush.bf16.msrb.mxu1 %v2798_v54  ;;  %1332 = vmatpush.bf16.msrb.mxu2 %v2802_v55  ;;  %v3378_v54 = vld [vmem:[%s4253_s8 + $0x204] sm:$0xf]  ;;  %v3003_v55 = vld [vmem:[%s4253_s8 + $0x230] sm:$0xf0] }
  0xa6   : > { %1345 = vmatpush.bf16.msrb.mxu3 %v2806_v58  ;;  %v3379_v58 = vld [vmem:[%s4253_s8 + $0x20c] sm:$0xf] }
  0xa8   : > { %1307 = vmatpush.bf16.msrb.mxu0 %v2746_v0  ;;  %v3010_v0 = vor.u32 %v3385_v57, %v3009_v56  ;;  %v3325_v56 = vld [vmem:[%s4253_s8 + $0x54] sm:$0xf0]  ;;  %v3319_v57 = vld [vmem:[%s4253_s8 + $0x2c] sm:$0xf] }
  0xa9   : > { %1320 = vmatpush.bf16.msrb.mxu1 %v2750_v6  ;;  %1333 = vmatpush.bf16.msrb.mxu2 %v2754_v10  ;;  %v3373_v6 = vld [vmem:[%s4253_s8 + $0x1d4] sm:$0xf0]  ;;  %v2958_v10 = vor.u32 %v3366_v3, %v2955_v4  ;;  %v757_v3 = vperm.slane %v525_v63, 2 }
  0xaa   : > { %1346 = vmatpush.bf16.msrb.mxu3 %v2758_v11  ;;  %v2905_v11 = vld [vmem:[%s4253_s8 + $0x140] sm:$0xf] }
  0xe3   : > { %v729_v33 = vpop.xlane.xlu0 %728 }
  0xe4   : > { %v730_v44 = vmul.f32 0.03125, %v729_v33  ;;  %v3403_v33 = vld [vmem:[%s4253_s8 + $0x2cc] sm:$0xf] }
  0xe5   : > { %v3110_v41 = vor.u32 %v3403_v33, %v3107_v34  ;;  %v2867_v33 = vld [vmem:[%s4253_s8 + $0x118] sm:$0xf0] }
  0xe6   : > { %v735_v60 = vmul.f32 %v730_v44, %v730_v44  ;;  %v738_v21 = vsub.f32 %v4266_v1, %v730_v44  ;;  %v3409_v1 = vld [vmem:[%s4253_s8 + $0x2f4] sm:$0xf0]  ;;  %v3057_v44 = vld [vmem:[%s4253_s8 + $0x268] sm:$0xf] }
  0xe7   : > { %v3106_v40 = vor.u32 %v3409_v1, %v3105_v31  ;;  %v3058_v52 = vor.u32 %v3397_v45, %v3057_v44  ;;  %v3349_v31 = vld [vmem:[%s4253_s8 + $0x114] sm:$0xf0]  ;;  %v3343_v1 = vld [vmem:[%s4253_s8 + $0xec] sm:$0xf] }
  0xe8   : > { %v2866_v39 = vor.u32 %v3349_v31, %v2865_v30  ;;  %v3337_v44 = vld [vmem:[%s4253_s8 + $0xb4] sm:$0xf0]  ;;  %v3331_v45 = vld [vmem:[%s4253_s8 + $0x8c] sm:$0xf] }
  0xe9   : > { %v529_v30 = vld [vmem:[%s4247_s3 + $0x28] sm:$0xff] }
  0xeb   : > { %v733_v59 = vpop.xlane.xlu0 %732 }
  0xec   : > { %v734_v61 = vmul.f32 0.03125, %v733_v59  ;;  %v3011_v59 = vld [vmem:[%s4253_s8 + $0x238] sm:$0xf0] }
  0xed   : > { %v3014_v2 = vor.u32 %v3379_v58, %v3011_v59  ;;  %v2771_v58 = vld [vmem:[%s4253_s8 + $0x58] sm:$0xf0] }
  0xee   : > { %v736_v5 = vsub.f32 %v734_v61, %v735_v60  ;;  %v3002_v60 = vor.u32 %v3384_v51, %v3001_v50  ;;  %v3006_v61 = vor.u32 %v3378_v54, %v3003_v55  ;;  %v3324_v50 = vld [vmem:[%s4253_s8 + $0x4c] sm:$0xf0]  ;;  %v2818_v51 = vor.u32 %v3337_v44, %v2817_v43  ;;  %v2763_v54 = vld [vmem:[%s4253_s8 + $0x50] sm:$0xf0]  ;;  %v2769_v55 = vld [vmem:[%s4253_s8 + $0x28] sm:$0xf] }
  0xef   : > { %v2774_v62 = vor.u32 %v3319_v57, %v2771_v58 }
  0xf0   : > { %v737_v12 = vmax.f32 %v736_v5, 0.0  ;;  %v2961_v5 = vld [vmem:[%s4253_s8 + $0x1a8] sm:$0xf] }
  0xf2   : > { %v739_v13 = vadd.f32 1e-12, %v737_v12  ;;  %v3360_v12 = vld [vmem:[%s4253_s8 + $0x16c] sm:$0xf0] }
  0xf4   : > { %3608 = vrsqrt.f32 %v739_v13  ;;  %vm746_vm1 = vweird.f32 %v739_v13 }
  0xfa   : > { %v3609_v14 = vpop.eup %3608 }
  0xfb   : > { %v741_v15 = vmul.f32 %v3609_v14, %v739_v13  ;;  %vm747_vm0 = vweird.f32 %v3609_v14  ;;  %v2962_v13 = vor.u32 %v3373_v6, %v2961_v5  ;;  %v526_v5 = vld [vmem:[%s4247_s3 + $0x10] sm:$0xff]  ;;  %v527_v6 = vld [vmem:[%s4247_s3 + $0x18] sm:$0xff] }
  0xfc   : > { %vm748_vm2 = vmor %vm746_vm1, %vm747_vm0 }
  0xfd   : > { %v742_v16 = vmul.f32 %v3609_v14, %v741_v15  ;;  %v3354_v15 = vld [vmem:[%s4253_s8 + $0x144] sm:$0xf] }
  0xff   : > { %v743_v17 = vmul.f32 0.5, %v742_v16  ;;  %v2907_v16 = vld [vmem:[%s4253_s8 + $0x170] sm:$0xf0] }
 0x101   : > { %v744_v19 = vsub.f32 1.5, %v743_v17  ;;  %v2913_v17 = vld [vmem:[%s4253_s8 + $0x148] sm:$0xf] }
 0x103   : > { %v745_v20 = vmul.f32 %v3609_v14, %v744_v19  ;;  %v3361_v19 = vld [vmem:[%s4253_s8 + $0x174] sm:$0xf0] }
 0x105   : > { %v749_v23 = vsel %vm748_vm2, %v3609_v14, %v745_v20  ;;  %v2966_v14 = vor.u32 %v3367_v7, %v2963_v8  ;;  %v3355_v20 = vld [vmem:[%s4253_s8 + $0x14c] sm:$0xf]  ;;  %v758_v7 = vperm.slane %v526_v5, 2  ;;  %v3976_v8 = vmov 1983009808  }
 0x106   : > { %v750_v25 = vmul.f32 %v749_v23, %v738_v21  ;;  %v2915_v21 = vld [vmem:[%s4253_s8 + $0x178] sm:$0xf0]  ;;  %v2910_v23 = vor.u32 %v3354_v15, %v2907_v16  ;;  %v3977_v15 = vmov 1934713408  }
 0x107   : > { %v2918_v27 = vor.u32 %v3355_v20, %v2915_v21 }
 0x108   : > { %v752_v26 = vmul.f32 %v751_v22, %v750_v25  ;;  %v2906_v22 = vor.u32 %v3360_v12, %v2905_v11  ;;  %v3348_v25 = vld [vmem:[%s4253_s8 + $0x10c] sm:$0xf0]  ;;  %v759_v12 = vperm.slane %v527_v6, 2 }
 0x10a   : > { %v4410_v32 = vadd.f32 %v753_v24, %v752_v26  ;;  %v2857_v24 = vld [vmem:[%s4253_s8 + $0xe0] sm:$0xf]  ;;  %v2914_v26 = vor.u32 %v3361_v19, %v2913_v17 }
 0x10b   : > { %v2858_v34 = vor.u32 %v3348_v25, %v2857_v24 }
 0x10c   : > { %v4417_v35 = vpack.c.bf16 %v4410_v32, %v4410_v32 }
 0x10e   : > { %1256 = vmatmul.bf16.vlgmr.msra.gmra.mxu0 %v4417_v35  ;;  %1269 = vmatmul.bf16.vlgmr.msra.gmra.mxu1 %v4417_v35 }
 0x10f   : > { %1282 = vmatmul.bf16.vlgmr.msra.gmra.mxu2 %v4417_v35  ;;  %1295 = vmatmul.bf16.vlgmr.msra.gmra.mxu3 %v4417_v35 }
 0x110   : > { %1352 = vmatpush.bf16.msra.mxu0 %v3098_v36  ;;  %1365 = vmatpush.bf16.msra.mxu1 %v3102_v37  ;;  %v2862_v36 = vor.u32 %v3342_v28, %v2859_v29  ;;  %v2809_v37 = vld [vmem:[%s4253_s8 + $0x80] sm:$0xf] }
 0x111   : > { %1378 = vmatpush.bf16.msra.mxu2 %v3106_v40  ;;  %1391 = vmatpush.bf16.msra.mxu3 %v3110_v41  ;;  %v2870_v40 = vor.u32 %v3343_v1, %v2867_v33  ;;  %v3330_v41 = vld [vmem:[%s4253_s8 + $0x84] sm:$0xf]  ;;  %v2810_v47 = vor.u32 %v3336_v38, %v2809_v37 }
 0x112   : > { %v528_v29 = vld [vmem:[%s4247_s3 + $0x20] sm:$0xff] }
 0x114   : > { %1353 = vmatpush.bf16.msra.mxu0 %v3050_v48  ;;  %1366 = vmatpush.bf16.msra.mxu1 %v3054_v49  ;;  %v2814_v48 = vor.u32 %v3330_v41, %v2811_v42  ;;  %v2761_v49 = vld [vmem:[%s4253_s8 + $0x20] sm:$0xf] }
 0x115   : > { %1379 = vmatpush.bf16.msra.mxu2 %v3058_v52  ;;  %1392 = vmatpush.bf16.msra.mxu3 %v3062_v53  ;;  %v2822_v52 = vor.u32 %v3331_v45, %v2819_v46  ;;  %v3318_v53 = vld [vmem:[%s4253_s8 + $0x24] sm:$0xf]  ;;  %v2762_v59 = vor.u32 %v3324_v50, %v2761_v49  ;;  %s3859_s8 = scalar_lea.hbm %s4867_s16, 16 }
 0x118   : > { %1354 = vmatpush.bf16.msra.mxu0 %v3002_v60  ;;  %1367 = vmatpush.bf16.msra.mxu1 %v3006_v61  ;;  %v2766_v60 = vor.u32 %v3318_v53, %v2763_v54  ;;  %v2770_v61 = vor.u32 %v3325_v56, %v2769_v55  ;;  %v531_v54 = vld [vmem:[%s4247_s3 + $0x38] sm:$0xff] }
 0x119   : > { %1380 = vmatpush.bf16.msra.mxu2 %v3010_v0  ;;  %1393 = vmatpush.bf16.msra.mxu3 %v3014_v2  ;;  %v756_v0 = vperm.slane %v4400_v18, 2  ;;  %v1434_v18 = vunpack.c.l.s4 %v3977_v15 }
 0x11b   : > { %v4501_v33 = vunpack.c.0.s8 %v1434_v18 }
 0x11c   : > { %1355 = vmatpush.bf16.msra.mxu0 %v2954_v9  ;;  %1368 = vmatpush.bf16.msra.mxu1 %v2958_v10  ;;  %v1410_v9 = vunpack.c.l.s4 %v3976_v8 }
 0x11d   : > { %1381 = vmatpush.bf16.msra.mxu2 %v2962_v13  ;;  %1394 = vmatpush.bf16.msra.mxu3 %v2966_v14 }
 0x11e   : > { %1308 = vmatmul.bf16.vlgmr.msrb.gmra.mxu0 %v4417_v35  ;;  %1321 = vmatmul.bf16.vlgmr.msrb.gmra.mxu1 %v4417_v35  ;;  %v4491_v14 = vunpack.c.0.s8 %v1410_v9 }
 0x11f   : > { %1334 = vmatmul.bf16.vlgmr.msrb.gmra.mxu2 %v4417_v35  ;;  %1347 = vmatmul.bf16.vlgmr.msrb.gmra.mxu3 %v4417_v35 }
 0x120   : > { %1356 = vmatpush.bf16.msra.mxu0 %v2906_v22  ;;  %1369 = vmatpush.bf16.msra.mxu1 %v2910_v23 }
 0x121   : > { %1382 = vmatpush.bf16.msra.mxu2 %v2914_v26  ;;  %1395 = vmatpush.bf16.msra.mxu3 %v2918_v27 }
 0x124   : > { %1357 = vmatpush.bf16.msra.mxu0 %v2858_v34  ;;  %1370 = vmatpush.bf16.msra.mxu1 %v2862_v36 }
 0x125   : > { %1383 = vmatpush.bf16.msra.mxu2 %v2866_v39  ;;  %1396 = vmatpush.bf16.msra.mxu3 %v2870_v40  ;;  %v760_v39 = vperm.slane %v528_v29, 2  ;;  %v761_v40 = vperm.slane %v529_v30, 2 }
 0x128   : > { %1358 = vmatpush.bf16.msra.mxu0 %v2810_v47  ;;  %1371 = vmatpush.bf16.msra.mxu1 %v2814_v48 }
 0x129   : > { %1384 = vmatpush.bf16.msra.mxu2 %v2818_v51  ;;  %1397 = vmatpush.bf16.msra.mxu3 %v2822_v52  ;;  %v530_v51 = vld [vmem:[%s4247_s3 + $0x30] sm:$0xff] }
 0x12c   : > { %1359 = vmatpush.bf16.msra.mxu0 %v2762_v59  ;;  %1372 = vmatpush.bf16.msra.mxu1 %v2766_v60 }
 0x12d   : > { %1385 = vmatpush.bf16.msra.mxu2 %v2770_v61  ;;  %1398 = vmatpush.bf16.msra.mxu3 %v2774_v62  ;;  %v762_v61 = vperm.slane %v530_v51, 2  ;;  %v535_v51 = vld [vmem:[%s4247_s3 + $0x58] sm:$0xff] }
 0x12f   : > { %1360 = vmatmul.bf16.vlgmr.msra.gmra.mxu0 %v4417_v35  ;;  %1373 = vmatmul.bf16.vlgmr.msra.gmra.mxu1 %v4417_v35 }
 0x130   : > { %1386 = vmatmul.bf16.vlgmr.msra.gmra.mxu2 %v4417_v35  ;;  %1399 = vmatmul.bf16.vlgmr.msra.gmra.mxu3 %v4417_v35 }
 0x18b   : > { %v1257_v2 = vpop.f32.mrf.mxu0  ;;  %v1270_v4 = vpop.f32.mrf.mxu1 }
 0x18c   : > { %v1258_v10 = vadd.f32 %v1257_v2, %v756_v0  ;;  %v1271_v11 = vadd.f32 %v1270_v4, %v757_v3  ;;  %v763_v2 = vperm.slane %v531_v54, 2 }
 0x18e   : > { %v1407_v16 = vrot.slane %v1258_v10, 4  ;;  %v1419_v17 = vrot.slane %v1271_v11, 4 }
 0x192   : > { %v1283_v13 = vpop.f32.mrf.mxu2  ;;  %v1296_v35 = vpop.f32.mrf.mxu3 }
 0x193   : > { %v1284_v19 = vadd.f32 %v1283_v13, %v758_v7  ;;  %v1297_v20 = vadd.f32 %v1296_v35, %v759_v12  ;;  %v1259_v21 = vpop.f32.mrf.mxu0  ;;  %v1272_v22 = vpop.f32.mrf.mxu1 }
 0x195   : > { %v1404_v23 = vrot.slane %v1284_v19, 4  ;;  %v1408_v24 = vsel %vm1405_vm3, %v1284_v19, %v1407_v16  ;;  %v1417_v25 = vrot.slane %v1297_v20, 4  ;;  %v1420_v26 = vsel %vm1405_vm3, %v1297_v20, %v1419_v17 }
 0x196   : > { %v1416_v27 = vperm.slane %v1408_v24, %v4491_v14  ;;  %v1428_v28 = vperm.slane %v1420_v26, %v4491_v14  ;;  %v532_v26 = vld [vmem:[%s4247_s3 + $0x40] sm:$0xff] }
 0x197   : > { %v1406_v31 = vsel %vm1405_vm3, %v1404_v23, %v1258_v10  ;;  %v1418_v1 = vsel %vm1405_vm3, %v1417_v25, %v1271_v11 }
 0x198   : > { %v1412_v34 = vperm.slane %v1406_v31, %v4491_v14  ;;  %v1443_v36 = vrot.slane %v1416_v27, 4  ;;  %v1424_v37 = vperm.slane %v1418_v1, %v4491_v14  ;;  %v1441_v38 = vrot.slane %v1428_v28, 4 }
 0x19a   : > { %v1431_v41 = vrot.slane %v1412_v34, 4  ;;  %v1429_v42 = vrot.slane %v1424_v37, 4  ;;  %v1442_v43 = vsel %vm1405_vm3, %v1441_v38, %v1416_v27  ;;  %v1444_v44 = vsel %vm1405_vm3, %v1428_v28, %v1443_v36  ;;  %v1285_v45 = vpop.f32.mrf.mxu2  ;;  %v1298_v46 = vpop.f32.mrf.mxu3 }
 0x19b   : > { %v1448_v47 = vperm.slane %v1442_v43, %v4501_v33  ;;  %v1452_v48 = vperm.slane %v1444_v44, %v4501_v33  ;;  %v1309_v49 = vpop.f32.mrf.mxu0  ;;  %v1322_v50 = vpop.f32.mrf.mxu1 }
 0x19c   : > { %v1430_v52 = vsel %vm1405_vm3, %v1429_v42, %v1412_v34  ;;  %v1432_v53 = vsel %vm1405_vm3, %v1424_v37, %v1431_v41  ;;  %v1310_v59 = vadd.f32 %v1309_v49, %v760_v39  ;;  %v1323_v60 = vadd.f32 %v1322_v50, %v761_v40  ;;  %v533_v37 = vld [vmem:[%s4247_s3 + $0x48] sm:$0xff]  ;;  %v534_v50 = vld [vmem:[%s4247_s3 + $0x50] sm:$0xff] }
 0x19d   : > { %v1436_v55 = vperm.slane %v1430_v52, %v4501_v33  ;;  %v1440_v56 = vperm.slane %v1432_v53, %v4501_v33  ;;  %v1457_v57 = vrot.slane %v1448_v47, 4  ;;  %v1459_v58 = vrot.slane %v1452_v48, 4 }
 0x19e   : > { %v1517_v8 = vrot.slane %v1310_v59, 4  ;;  %v1529_v9 = vrot.slane %v1323_v60, 4  ;;  %v764_v39 = vperm.slane %v532_v26, 2  ;;  %v765_v49 = vperm.slane %v533_v37, 2 }
 0x19f   : > { %v1453_v62 = vrot.slane %v1436_v55, 4  ;;  %v1455_v63 = vrot.slane %v1440_v56, 4  ;;  %v1460_v0 = vsel %vm1405_vm3, 0.0, %v1459_v58  ;;  %v1458_v5 = vsel %vm1405_vm3, 0.0, %v1457_v57 }
 0x1a0   : > { %v1477_v3 = vrot.slane %v1460_v0, 4  ;;  %v1472_v23 = vsel %vm1405_vm3, %v1459_v58, %v1448_v47  ;;  %v767_v0 = vperm.slane %v535_v51, 2 }
 0x1a1   : > { %v1456_v4 = vsel %vm1405_vm3, 0.0, %v1455_v63  ;;  %v1454_v12 = vsel %vm1405_vm3, 0.0, %v1453_v62  ;;  %v4540_v38 = vperm.slane %v1472_v23, %v4491_v14  ;;  %v1461_v46 = vsel %vm1405_vm3, %v1455_v63, %v1436_v55 }
 0x1a2   : > { %v1466_v6 = vrot.slane %v1456_v4, 4  ;;  %v1478_v7 = vsel %vm1405_vm3, %v1477_v3, %v1458_v5  ;;  %v1335_v10 = vpop.f32.mrf.mxu2  ;;  %v1348_v11 = vpop.f32.mrf.mxu3  ;;  %v766_v63 = vperm.slane %v534_v50, 2 }
 0x1a3   : > { %v4521_v13 = vperm.slane %v1478_v7, %v4491_v14  ;;  %v1336_v35 = vadd.f32 %v1335_v10, %v762_v61  ;;  %v1349_v15 = vadd.f32 %v1348_v11, %v763_v2  ;;  %v1311_v18 = vpop.f32.mrf.mxu0  ;;  %v1324_v16 = vpop.f32.mrf.mxu1  ;;  %v4557_v2 = vperm.slane %v1461_v46, %v4491_v14 }
 0x1a4   : > { %v1467_v17 = vsel %vm1405_vm3, %v1466_v6, %v1454_v12 }
 0x1a5   : > { %v1515_v19 = vrot.slane %v1336_v35, 4  ;;  %v1518_v20 = vsel %vm1405_vm3, %v1336_v35, %v1517_v8  ;;  %v1527_v21 = vrot.slane %v1349_v15, 4  ;;  %v1530_v22 = vsel %vm1405_vm3, %v1349_v15, %v1529_v9 }
 0x1a6   : > { %v1526_v24 = vperm.slane %v1518_v20, %v4491_v14  ;;  %v1538_v25 = vperm.slane %v1530_v22, %v4491_v14  ;;  %v4533_v29 = vperm.slane %v1467_v17, %v4491_v14  ;;  %v1495_v30 = vrot.slane %v4521_v13, 4 }
 0x1a7   : > { %v1516_v27 = vsel %vm1405_vm3, %v1515_v19, %v1310_v59  ;;  %v1528_v28 = vsel %vm1405_vm3, %v1527_v21, %v1323_v60 }
 0x1a8   : > { %v1522_v31 = vperm.slane %v1516_v27, %v4491_v14  ;;  %v1553_v1 = vrot.slane %v1526_v24, 4  ;;  %v1534_v34 = vperm.slane %v1528_v28, %v4491_v14  ;;  %v1551_v36 = vrot.slane %v1538_v25, 4 }
 0x1a9   : > { %v1483_v57 = vrot.slane %v4533_v29, 4  ;;  %v1496_v58 = vsel %vm1405_vm3, %v1495_v30, %v4540_v38 }
 0x1aa   : > { %v1541_v40 = vrot.slane %v1522_v31, 4  ;;  %v1539_v41 = vrot.slane %v1534_v34, 4  ;;  %v1552_v42 = vsel %vm1405_vm3, %v1551_v36, %v1526_v24  ;;  %v1554_v43 = vsel %vm1405_vm3, %v1538_v25, %v1553_v1  ;;  %v1337_v44 = vpop.f32.mrf.mxu2  ;;  %v1350_v45 = vpop.f32.mrf.mxu3 }
 0x1ab   : > { %v1558_v47 = vperm.slane %v1552_v42, %v4501_v33  ;;  %v1562_v48 = vperm.slane %v1554_v43, %v4501_v33  ;;  %v1484_v9 = vsel %vm1405_vm3, %v1483_v57, %v4557_v2  ;;  %v4564_v10 = vperm.slane %v1496_v58, %v4501_v33 }
 0x1ac   : > { %v1540_v52 = vsel %vm1405_vm3, %v1539_v41, %v1522_v31  ;;  %v1542_v53 = vsel %vm1405_vm3, %v1534_v34, %v1541_v40  ;;  %v1361_v54 = vpop.f32.mrf.mxu0  ;;  %v1374_v56 = vpop.f32.mrf.mxu1 }
 0x1ad   : > { %v1546_v55 = vperm.slane %v1540_v52, %v4501_v33  ;;  %v1550_v59 = vperm.slane %v1542_v53, %v4501_v33  ;;  %v1567_v60 = vrot.slane %v1558_v47, 4  ;;  %v1569_v61 = vrot.slane %v1562_v48, 4 }
 0x1ae   : > { %v1362_v62 = vadd.f32 %v1361_v54, %v764_v39  ;;  %v1375_v6 = vadd.f32 %v1374_v56, %v765_v49  ;;  %v4578_v39 = vperm.slane %v1484_v9, %v4501_v33 }
 0x1af   : > { %v1563_v3 = vrot.slane %v1546_v55, 4  ;;  %v1565_v4 = vrot.slane %v1550_v59, 4  ;;  %v1570_v5 = vsel %vm1405_vm3, 0.0, %v1569_v61  ;;  %v1582_v7 = vsel %vm1405_vm3, %v1569_v61, %v1558_v47 }
 0x1b0   : > { %v1587_v8 = vrot.slane %v1570_v5, 4  ;;  %v1568_v12 = vsel %vm1405_vm3, 0.0, %v1567_v60  ;;  %v1586_v15 = vperm.slane %v1582_v7, %v4491_v14  ;;  %v1627_v17 = vrot.slane %v1362_v62, 4 }
 0x1b1   : > { %v1566_v11 = vsel %vm1405_vm3, 0.0, %v1565_v4  ;;  %v1571_v35 = vsel %vm1405_vm3, %v1565_v4, %v1546_v55  ;;  %v1564_v20 = vsel %vm1405_vm3, 0.0, %v1563_v3  ;;  %v1639_v23 = vrot.slane %v1375_v6, 4 }
 0x1b2   : > { %v1576_v18 = vrot.slane %v1566_v11, 4  ;;  %v1588_v16 = vsel %vm1405_vm3, %v1587_v8, %v1568_v12  ;;  %v1575_v19 = vperm.slane %v1571_v35, %v4491_v14  ;;  %v1607_v22 = vrot.slane %v1586_v15, 4 }
 0x1b3   : > { %v1592_v21 = vperm.slane %v1588_v16, %v4491_v14  ;;  %v1387_v24 = vpop.f32.mrf.mxu2  ;;  %v1400_v25 = vpop.f32.mrf.mxu3  ;;  %v1507_v12 = vrot.slane %v4564_v10, 4  ;;  %v1509_v16 = vrot.slane %v4578_v39, 4 }
 0x1b4   : > { %v1388_v26 = vadd.f32 %v1387_v24, %v766_v63  ;;  %v1401_v27 = vadd.f32 %v1400_v25, %v767_v0  ;;  %v1363_v28 = vpop.f32.mrf.mxu0  ;;  %v1376_v30 = vpop.f32.mrf.mxu1  ;;  %v1577_v31 = vsel %vm1405_vm3, %v1576_v18, %v1564_v20  ;;  %v1595_v1 = vrot.slane %v1575_v19, 4 }
 0x1b5   : > { %v1581_v34 = vperm.slane %v1577_v31, %v4491_v14  ;;  %v1605_v36 = vrot.slane %v1592_v21, 4  ;;  %v1608_v37 = vsel %vm1405_vm3, %v1592_v21, %v1607_v22 }
 0x1b6   : > { %v1625_v40 = vrot.slane %v1388_v26, 4  ;;  %v1628_v41 = vsel %vm1405_vm3, %v1388_v26, %v1627_v17  ;;  %v1637_v42 = vrot.slane %v1401_v27, 4  ;;  %v1640_v43 = vsel %vm1405_vm3, %v1401_v27, %v1639_v23 }
 0x1b7   : > { %v1636_v44 = vperm.slane %v1628_v41, %v4491_v14  ;;  %v1648_v45 = vperm.slane %v1640_v43, %v4491_v14  ;;  %v1593_v46 = vrot.slane %v1581_v34, 4  ;;  %v1606_v47 = vsel %vm1405_vm3, %v1605_v36, %v1586_v15 }
 0x1b8   : > { %v1626_v48 = vsel %vm1405_vm3, %v1625_v40, %v1362_v62  ;;  %v1638_v49 = vsel %vm1405_vm3, %v1637_v42, %v1375_v6  ;;  %v1612_v50 = vperm.slane %v1606_v47, %v4501_v33  ;;  %v1596_v51 = vsel %vm1405_vm3, %v1581_v34, %v1595_v1 }
 0x1b9   : > { %v1632_v52 = vperm.slane %v1626_v48, %v4491_v14  ;;  %v1663_v53 = vrot.slane %v1636_v44, 4  ;;  %v1644_v54 = vperm.slane %v1638_v49, %v4491_v14  ;;  %v1661_v56 = vrot.slane %v1648_v45, 4 }
 0x1ba   : > { %v1594_v57 = vsel %vm1405_vm3, %v1593_v46, %v1575_v19  ;;  %v1617_v58 = vrot.slane %v1612_v50, 4  ;;  %v1604_v55 = vperm.slane %v1596_v51, %v4501_v33  ;;  %v1616_v59 = vperm.slane %v1608_v37, %v4501_v33 }
 0x1bb   : > { %v1651_v60 = vrot.slane %v1632_v52, 4  ;;  %v1649_v61 = vrot.slane %v1644_v54, 4  ;;  %v1662_v62 = vsel %vm1405_vm3, %v1661_v56, %v1636_v44  ;;  %v1664_v63 = vsel %vm1405_vm3, %v1648_v45, %v1663_v53  ;;  %v1389_v0 = vpop.f32.mrf.mxu2  ;;  %v1402_v3 = vpop.f32.mrf.mxu3 }
 0x1bc   : > { %v1668_v4 = vperm.slane %v1662_v62, %v4501_v33  ;;  %v1672_v5 = vperm.slane %v1664_v63, %v4501_v33  ;;  %v1600_v6 = vperm.slane %v1594_v57, %v4501_v33  ;;  %v1621_v7 = vrot.slane %v1616_v59, 4 }
 0x1bd   : > { %v1650_v8 = vsel %vm1405_vm3, %v1649_v61, %v1632_v52  ;;  %v1652_v9 = vsel %vm1405_vm3, %v1644_v54, %v1651_v60  ;;  %v1623_v11 = vrot.slane %v1604_v55, 4  ;;  %v1497_v47 = vrot.slane %v4540_v38, 4 }
 0x1be   : > { %v1656_v35 = vperm.slane %v1650_v8, %v4501_v33  ;;  %v1660_v15 = vperm.slane %v1652_v9, %v4501_v33  ;;  %v1679_v18 = vrot.slane %v1672_v5, 4  ;;  %v1677_v17 = vrot.slane %v1668_v4, 4 }
 0x1bf   : > { %v1618_v19 = vsel %vm1405_vm3, %v1617_v58, %v1600_v6  ;;  %v1622_v20 = vsel %vm1405_vm3, %v1621_v7, %v1604_v55  ;;  %v1619_v21 = vrot.slane %v1600_v6, 4  ;;  %v1624_v25 = vsel %vm1405_vm3, %v1616_v59, %v1623_v11 }
 0x1c0   : > { %v1673_v22 = vrot.slane %v1656_v35, 4  ;;  %v1675_v23 = vrot.slane %v1660_v15, 4  ;;  %v1680_v24 = vsel %vm1405_vm3, 0.0, %v1679_v18  ;;  %v1692_v26 = vsel %vm1405_vm3, %v1679_v18, %v1668_v4 }
 0x1c1   : > { %v1697_v27 = vrot.slane %v1680_v24, 4  ;;  %v1739_v28 = vpack.c.bf16 %v1618_v19, %v1618_v19  ;;  %v1741_v30 = vpack.c.bf16 %v1622_v20, %v1622_v20  ;;  %v1696_v34 = vperm.slane %v1692_v26, %v4491_v14 }
 0x1c2   : > { %v1676_v31 = vsel %vm1405_vm3, 0.0, %v1675_v23  ;;  %v1681_v1 = vsel %vm1405_vm3, %v1675_v23, %v1656_v35  ;;  %v1620_v36 = vsel %vm1405_vm3, %v1612_v50, %v1619_v21  ;;  %v1678_v37 = vsel %vm1405_vm3, 0.0, %v1677_v17 }
 0x1c3   : > { %v1686_v40 = vrot.slane %v1676_v31, 4  ;;  %1751 = vmatpush.bf16.xpose.msrb.mxu2 %v1739_v28  ;;  %v1740_v41 = vpack.c.bf16 %v1620_v36, %v1620_v36  ;;  %v1742_v42 = vpack.c.bf16 %v1624_v25, %v1624_v25  ;;  %v1674_v43 = vsel %vm1405_vm3, 0.0, %v1673_v22 }
 0x1c4   : > { %v1685_v44 = vperm.slane %v1681_v1, %v4491_v14  ;;  %v1698_v45 = vsel %vm1405_vm3, %v1697_v27, %v1678_v37  ;;  %v1717_v46 = vrot.slane %v1696_v34, 4  ;;  %v1508_v48 = vsel %vm1405_vm3, %v1507_v12, %v4578_v39  ;;  %v1743_v27 = vld [vmem:[#allocation5] sm:$0xff] }
 0x1c5   : > { %1764 = vmatpush.bf16.xpose.msrb.mxu3 %v1740_v41  ;;  %v1687_v49 = vsel %vm1405_vm3, %v1686_v40, %v1674_v43  ;;  %v1702_v50 = vperm.slane %v1698_v45, %v4491_v14  ;;  %v1510_v53 = vsel %vm1405_vm3, %v4564_v10, %v1509_v16  ;;  %v1485_v38 = vrot.slane %v4557_v2, 4 }
 0x1c6   : > { %v1691_v51 = vperm.slane %v1687_v49, %v4491_v14  ;;  %v1705_v52 = vrot.slane %v1685_v44, 4  ;;  %v1735_v57 = vpack.c.bf16 %v1508_v48, %v1508_v48  ;;  %v1498_v61 = vsel %vm1405_vm3, %v4521_v13, %v1497_v47 }
 0x1c7   : > { %v1718_v54 = vsel %vm1405_vm3, %v1702_v50, %v1717_v46  ;;  %v1715_v56 = vrot.slane %v1702_v50, 4  ;;  %v1736_v10 = vpack.c.bf16 %v1510_v53, %v1510_v53  ;;  %v1486_v6 = vsel %vm1405_vm3, %v4533_v29, %v1485_v38 }
 0x1c8   : > { %v1706_v58 = vsel %vm1405_vm3, %v1691_v51, %v1705_v52  ;;  %v1726_v39 = vperm.slane %v1718_v54, %v4501_v33  ;;  %v1703_v55 = vrot.slane %v1691_v51, 4  ;;  %v1506_v9 = vperm.slane %v1498_v61, %v4501_v33 }
 0x1c9   : > { %v1714_v59 = vperm.slane %v1706_v58, %v4501_v33  ;;  %v1716_v60 = vsel %vm1405_vm3, %v1715_v56, %v1696_v34  ;;  %v1494_v16 = vperm.slane %v1486_v6, %v4501_v33 }
 0x1ca   : > { %1752 = vmatmul.bf16.vlgmr.msrb.gmra.mxu2 %v1735_v57  ;;  %v1731_v62 = vrot.slane %v1726_v39, 4  ;;  %v1704_v63 = vsel %vm1405_vm3, %v1703_v55, %v1685_v44  ;;  %v1722_v2 = vperm.slane %v1716_v60, %v4501_v33  ;;  %v1511_v20 = vrot.slane %v1506_v9, 4 }
 0x1cb   : > { %1777 = vmatpush.bf16.xpose.msra.mxu2 %v1741_v30  ;;  %v1710_v0 = vperm.slane %v1704_v63, %v4501_v33  ;;  %v1733_v3 = vrot.slane %v1714_v59, 4  ;;  %v1513_v22 = vrot.slane %v1494_v16, 4 }
 0x1cc   : > { %1765 = vmatmul.bf16.vlgmr.msrb.gmra.mxu3 %v1736_v10  ;;  %v1732_v4 = vsel %vm1405_vm3, %v1731_v62, %v1714_v59  ;;  %v1727_v5 = vrot.slane %v1722_v2, 4  ;;  %v1512_v23 = vsel %vm1405_vm3, %v1511_v20, %v1494_v16 }
 0x1cd   : > { %1790 = vmatpush.bf16.xpose.msra.mxu3 %v1742_v42  ;;  %v1899_v7 = vpack.c.bf16 %v1732_v4, %v1732_v4  ;;  %v1734_v13 = vsel %vm1405_vm3, %v1726_v39, %v1733_v3  ;;  %v1729_v8 = vrot.slane %v1710_v0, 4  ;;  %v1514_v24 = vsel %vm1405_vm3, %v1506_v9, %v1513_v22 }
 0x1ce   : > { %v1728_v11 = vsel %vm1405_vm3, %v1727_v5, %v1710_v0  ;;  %v1900_v12 = vpack.c.bf16 %v1734_v13, %v1734_v13  ;;  %v1737_v25 = vpack.c.bf16 %v1512_v23, %v1512_v23  ;;  %v1738_v26 = vpack.c.bf16 %v1514_v24, %v1514_v24 }
 0x1cf   : > { %v1944_v35 = vsel %vm1904_vm4, %v1899_v7, 0  ;;  %v1897_v15 = vpack.c.bf16 %v1728_v11, %v1728_v11  ;;  %v1730_v18 = vsel %vm1405_vm3, %v1722_v2, %v1729_v8 }
 0x1d0   : > { %v1963_v17 = vsel %vm1904_vm4, %v1900_v12, 0  ;;  %v1898_v29 = vpack.c.bf16 %v1730_v18, %v1730_v18 }
 0x1d1   : > { %v1906_v19 = vsel %vm1904_vm4, %v1897_v15, 0 }
 0x1d2   : > { %1915 = vmatpush.bf16.msrb.mxu0 %v1906_v19  ;;  %v1925_v21 = vsel %vm1904_vm4, %v1898_v29, 0 }
 0x1d3   : > { %1953 = vmatpush.bf16.msrb.mxu2 %v1944_v35  ;;  %1934 = vmatpush.bf16.msrb.mxu1 %v1925_v21 }
 0x1d5   : > { %1972 = vmatpush.bf16.msrb.mxu3 %v1963_v17 }
 0x1da   : > { %1778 = vmatmul.bf16.vlgmr.msra.gmra.mxu2 %v1737_v25 }
 0x1dc   : > { %1791 = vmatmul.bf16.vlgmr.msra.gmra.mxu3 %v1738_v26 }
 0x24d   : > { %v1753_v28 = vpop.f32.mrf.mxu2 }
 0x24e   : > { %v1754_v30 = vadd.f32 %v1753_v28, %v1743_v27 }
 0x24f   : > { %v1766_v31 = vpop.f32.mrf.mxu3 }
 0x250   : > { %v1797_v1 = vsel %vm1796_vm5, %v1754_v30, -inf  ;;  %v1767_v34 = vadd.f32 %v1766_v31, %v1743_v27 }
 0x251   : > { %1798 = vmax.xlane.f32.xlu2 %v1797_v1 }
 0x252   : > { %v1800_v40 = vsel %vm1796_vm5, %v1767_v34, -inf }
 0x255   : > { %v1755_v36 = vpop.f32.mrf.mxu2 }
 0x257   : > { %v1768_v37 = vpop.f32.mrf.mxu3 }
 0x259   : > { %1801 = vmax.xlane.f32.xlu2 %v1800_v40 }
 0x25d   : > { %v1779_v41 = vpop.f32.mrf.mxu2 }
 0x25e   : > { %v1780_v42 = vadd.f32 %v1779_v41, %v1743_v27 }
 0x25f   : > { %v1792_v43 = vpop.f32.mrf.mxu3 }
 0x260   : > { %v1803_v44 = vsel %vm1796_vm5, %v1780_v42, -inf  ;;  %v1793_v45 = vadd.f32 %v1792_v43, %v1743_v27 }
 0x261   : > { %1804 = vmax.xlane.f32.xlu1 %v1803_v44 }
 0x262   : > { %v1806_v48 = vsel %vm1796_vm5, %v1793_v45, -inf }
 0x265   : > { %v1781_v46 = vpop.f32.mrf.mxu2 }
 0x267   : > { %v1794_v47 = vpop.f32.mrf.mxu3 }
 0x269   : > { %1807 = vmax.xlane.f32.xlu1 %v1806_v48 }
 0x2c4   : > { %v1799_v49 = vpop.xlane.xlu2 %1798 }
 0x2c5   : > { %v1809_v50 = vsub.f32 %v1754_v30, %v1799_v49 }
 0x2c7   : > { %v1813_v51 = vmul.f32 1.442695, %v1809_v50 }
 0x2c9   : > { %3610 = vpow2.f32 %v1813_v51 }
 0x2cc   : > { %v1802_v54 = vpop.xlane.xlu2 %1801 }
 0x2cd   : > { %v1810_v57 = vsub.f32 %v1767_v34, %v1802_v54 }
 0x2cf   : > { %v3611_v52 = vpop.eup %3610  ;;  %v1815_v39 = vmul.f32 1.442695, %v1810_v57 }
 0x2d0   : > { %v1821_v53 = vsel %vm1796_vm5, %v3611_v52, 0.0 }
 0x2d1   : > { %1822 = vadd.xlane.f32.xlu2 %v1821_v53 }
 0x2d4   : > { %v1805_v56 = vpop.xlane.xlu1 %1804 }
 0x2d5   : > { %v1811_v38 = vsub.f32 %v1780_v42, %v1805_v56 }
 0x2d7   : > { %v1817_v58 = vmul.f32 1.442695, %v1811_v38 }
 0x2d9   : > { %3612 = vpow2.f32 %v1817_v58 }
 0x2da   : > { %3614 = vpow2.f32 %v1815_v39 }
 0x2dc   : > { %v1808_v55 = vpop.xlane.xlu1 %1807 }
 0x2dd   : > { %v1812_v59 = vsub.f32 %v1793_v45, %v1808_v55  ;;  %v3433_v55 = vld [vmem:[%s4255_s0 + $0xb8] sm:$0xff] }
 0x2de   : > { %2311 = vmatpush.bf16.msra.mxu2 %v3433_v55 }
 0x2df   : > { %v3613_v60 = vpop.eup %3612  ;;  %v1819_v61 = vmul.f32 1.442695, %v1812_v59  ;;  %v3417_v59 = vld [vmem:[%s4255_s0 + $0x38] sm:$0xff] }
 0x2e0   : > { %v1827_v10 = vsel %vm1796_vm5, %v3613_v60, 0.0  ;;  %v4657_v62 = vpop.eup %3614  ;;  %2285 = vmatpush.bf16.msra.mxu0 %v3417_v59 }
 0x2e1   : > { %3616 = vpow2.f32 %v1819_v61  ;;  %1828 = vadd.xlane.f32.xlu0 %v1827_v10  ;;  %v1824_v0 = vsel %vm1796_vm5, %v4657_v62, 0.0  ;;  %v3425_v61 = vld [vmem:[%s4255_s0 + $0x78] sm:$0xff]  ;;  %v3432_v10 = vld [vmem:[%s4255_s0 + $0xb0] sm:$0xff] }
 0x2e2   : > { %2298 = vmatpush.bf16.msra.mxu1 %v3425_v61  ;;  %2312 = vmatpush.bf16.msra.mxu2 %v3432_v10 }
 0x2e7   : > { %v4659_v63 = vpop.eup %3616 }
 0x2e8   : > { %v1830_v2 = vsel %vm1796_vm5, %v4659_v63, 0.0 }
 0x2e9   : > { %1831 = vadd.xlane.f32.xlu1 %v1830_v2  ;;  %1825 = vadd.xlane.f32.xlu0 %v1824_v0 }
 0x344   : > { %v1823_v3 = vpop.xlane.xlu2 %1822 }
 0x345   : > { %3618 = vrcp.f32 %v1823_v3  ;;  %v1844_v7 = vand.u32 2147483648, %v1823_v3  ;;  %v1842_v8 = vand.u32 2147483647, %v1823_v3  ;;  %vm1838_vm7 = vweird.f32 %v1823_v3 }
 0x347   : > { %v1845_v11 = vor.u32 1.1754944e-38, %v1844_v7  ;;  %vm1843_vm9 = vcmp.eq.f32.partialorder %v1842_v8, 8.507059e+37  ;;  %v3423_v7 = vld [vmem:[%s4255_s0 + $0x68] sm:$0xff]  ;;  %v3414_v8 = vld [vmem:[%s4255_s0 + $0x20] sm:$0xff] }
 0x34b   : > { %v3619_v4 = vpop.eup %3618 }
 0x34c   : > { %v1834_v5 = vmul.f32 %v3619_v4, %v1823_v3  ;;  %vm1839_vm6 = vweird.f32 %v3619_v4  ;;  %v3424_v3 = vld [vmem:[%s4255_s0 + $0x70] sm:$0xff] }
 0x34d   : > { %vm1840_vm8 = vmor %vm1838_vm7, %vm1839_vm6  ;;  %2299 = vmatpush.bf16.msra.mxu1 %v3424_v3 }
 0x34e   : > { %v1835_v6 = vsub.f32 1.0, %v1834_v5  ;;  %v3415_v5 = vld [vmem:[%s4255_s0 + $0x28] sm:$0xff] }
 0x350   : > { %v1836_v13 = vmul.f32 %v3619_v4, %v1835_v6  ;;  %v3439_v6 = vld [vmem:[%s4255_s0 + $0xe8] sm:$0xff] }
 0x351   : > { %2300 = vmatpush.bf16.msra.mxu1 %v3423_v7 }
 0x352   : > { %v1837_v9 = vadd.f32 %v3619_v4, %v1836_v13  ;;  %v3430_v13 = vld [vmem:[%s4255_s0 + $0xa0] sm:$0xff] }
 0x354   : > { %v1841_v12 = vsel %vm1840_vm8, %v3619_v4, %v1837_v9  ;;  %v1829_v35 = vpop.xlane.xlu0 %1828  ;;  %v3431_v4 = vld [vmem:[%s4255_s0 + $0xa8] sm:$0xff]  ;;  %v3438_v9 = vld [vmem:[%s4255_s0 + $0xe0] sm:$0xff] }
 0x355   : > { %v1846_v15 = vsel %vm1843_vm9, %v1845_v11, %v1841_v12  ;;  %3620 = vrcp.f32 %v1829_v35  ;;  %v1874_v22 = vand.u32 2147483648, %v1829_v35  ;;  %v1872_v24 = vand.u32 2147483647, %v1829_v35  ;;  %2313 = vmatpush.bf16.msra.mxu2 %v3431_v4  ;;  %v3422_v11 = vld [vmem:[%s4255_s0 + $0x60] sm:$0xff]  ;;  %v3429_v12 = vld [vmem:[%s4255_s0 + $0x98] sm:$0xff] }
 0x356   : > { %v1847_v18 = vmul.f32 %v3611_v52, %v1846_v15  ;;  %vm1868_vm11 = vweird.f32 %v1829_v35  ;;  %v3437_v15 = vld [vmem:[%s4255_s0 + $0xd8] sm:$0xff]  ;;  %2301 = vmatpush.bf16.msra.mxu1 %v3422_v11 }
 0x357   : > { %v1875_v27 = vor.u32 1.1754944e-38, %v1874_v22  ;;  %vm1873_vm13 = vcmp.eq.f32.partialorder %v1872_v24, 8.507059e+37 }
 0x358   : > { %v1893_v16 = vpack.c.bf16 %v1847_v18, %v1847_v18 }
 0x359   : > { %2314 = vmatpush.bf16.msra.mxu2 %v3430_v13 }
 0x35a   : > { %3111 = vmatmul.msk.bf16.vlgmr.msrb.gmra.mxu0 %vm1796_vm5, %v1893_v16 }
 0x35b   : > { %v3621_v17 = vpop.eup %3620 }
 0x35c   : > { %v1864_v29 = vmul.f32 %v3621_v17, %v1829_v35  ;;  %v1832_v19 = vpop.xlane.xlu1 %1831  ;;  %v1826_v20 = vpop.xlane.xlu0 %1825  ;;  %vm1869_vm10 = vweird.f32 %v3621_v17  ;;  %v3413_v35 = vld [vmem:[%s4255_s0 + $0x18] sm:$0xff] }
 0x35d   : > { %3622 = vrcp.f32 %v1832_v19  ;;  %vm1870_vm12 = vmor %vm1868_vm11, %vm1869_vm10  ;;  %v1887_v40 = vand.u32 2147483647, %v1832_v19  ;;  %v1889_v41 = vand.u32 2147483648, %v1832_v19  ;;  %v1859_v44 = vand.u32 2147483648, %v1826_v20  ;;  %2315 = vmatpush.bf16.msra.mxu2 %v3429_v12 }
 0x35e   : > { %v1865_v21 = vsub.f32 1.0, %v1864_v29  ;;  %3624 = vrcp.f32 %v1826_v20  ;;  %v1857_v47 = vand.u32 2147483647, %v1826_v20  ;;  %vm1883_vm0 = vweird.f32 %v1832_v19  ;;  %v3421_v29 = vld [vmem:[%s4255_s0 + $0x58] sm:$0xff] }
 0x35f   : > { %v1890_v49 = vor.u32 1.1754944e-38, %v1889_v41  ;;  %vm1853_vm2 = vweird.f32 %v1826_v20  ;;  %vm1888_vm4 = vcmp.eq.f32.partialorder %v1887_v40, 8.507059e+37  ;;  %v1860_v52 = vor.u32 1.1754944e-38, %v1859_v44  ;;  %2302 = vmatpush.bf16.msra.mxu1 %v3421_v29  ;;  %v3419_v41 = vld [vmem:[%s4255_s0 + $0x48] sm:$0xff] }
 0x360   : > { %v1866_v23 = vmul.f32 %v3621_v17, %v1865_v21  ;;  %vm1858_vm7 = vcmp.eq.f32.partialorder %v1857_v47, 8.507059e+37  ;;  %v3436_v21 = vld [vmem:[%s4255_s0 + $0xd0] sm:$0xff] }
 0x362   : > { %v1867_v25 = vadd.f32 %v3621_v17, %v1866_v23 }
 0x363   : > { %v3623_v26 = vpop.eup %3622 }
 0x364   : > { %v3625_v28 = vpop.eup %3624  ;;  %v1871_v30 = vsel %vm1870_vm12, %v3621_v17, %v1867_v25  ;;  %v1879_v31 = vmul.f32 %v3623_v26, %v1832_v19  ;;  %vm1884_vm14 = vweird.f32 %v3623_v26  ;;  %v3428_v19 = vld [vmem:[%s4255_s0 + $0x90] sm:$0xff] }
 0x365   : > { %v1876_v1 = vsel %vm1873_vm13, %v1875_v27, %v1871_v30  ;;  %v1849_v34 = vmul.f32 %v3625_v28, %v1826_v20  ;;  %vm1854_vm15 = vweird.f32 %v3625_v28  ;;  %vm1885_vm1 = vmor %vm1883_vm0, %vm1884_vm14  ;;  %v3412_v20 = vld [vmem:[%s4255_s0 + $0x10] sm:$0xff]  ;;  %2316 = vmatpush.bf16.msra.mxu2 %v3428_v19  ;;  %v3435_v30 = vld [vmem:[%s4255_s0 + $0xc8] sm:$0xff] }
 0x366   : > { %v1877_v36 = vmul.f32 %v3613_v60, %v1876_v1  ;;  %v1880_v37 = vsub.f32 1.0, %v1879_v31  ;;  %vm1855_vm6 = vmor %vm1853_vm2, %vm1854_vm15  ;;  %v3441_v60 = vld [vmem:[%s4255_s0 + $0xf8] sm:$0xff]  ;;  %v3420_v25 = vld [vmem:[%s4255_s0 + $0x50] sm:$0xff] }
 0x367   : > { %v1850_v42 = vsub.f32 1.0, %v1849_v34  ;;  %2324 = vmatpush.bf16.msra.mxu3 %v3441_v60  ;;  %2303 = vmatpush.bf16.msra.mxu1 %v3420_v25 }
 0x368   : > { %v1881_v43 = vmul.f32 %v3623_v26, %v1880_v37  ;;  %v1895_v45 = vpack.c.bf16 %v1877_v36, %v1877_v36 }
 0x369   : > { %v1851_v46 = vmul.f32 %v3625_v28, %v1850_v42  ;;  %v3426_v42 = vld [vmem:[%s4255_s0 + $0x80] sm:$0xff] }
 0x36a   : > { %v1882_v48 = vadd.f32 %v3623_v26, %v1881_v43  ;;  %3113 = vmatmul.msk.bf16.vlgmr.msrb.gmra.mxu2 %vm1796_vm5, %v1895_v45  ;;  %v3410_v45 = vld [vmem:[%s4255_s0] sm:$0xff] }
 0x36b   : > { %v1852_v50 = vadd.f32 %v3625_v28, %v1851_v46  ;;  %v3434_v46 = vld [vmem:[%s4255_s0 + $0xc0] sm:$0xff]  ;;  %2304 = vmatpush.bf16.msra.mxu1 %v3419_v41 }
 0x36c   : > { %v1886_v51 = vsel %vm1885_vm1, %v3623_v26, %v1882_v48  ;;  %v3427_v26 = vld [vmem:[%s4255_s0 + $0x88] sm:$0xff] }
 0x36d   : > { %v1891_v53 = vsel %vm1888_vm4, %v1890_v49, %v1886_v51  ;;  %v1856_v54 = vsel %vm1855_vm6, %v3625_v28, %v1852_v50  ;;  %v3411_v28 = vld [vmem:[%s4255_s0 + $0x8] sm:$0xff]  ;;  %2317 = vmatpush.bf16.msra.mxu2 %v3427_v26 }
 0x36e   : > { %v1892_v56 = vmul.f32 %v4659_v63, %v1891_v53  ;;  %v1861_v38 = vsel %vm1858_vm7, %v1860_v52, %v1856_v54  ;;  %v3416_v63 = vld [vmem:[%s4255_s0 + $0x30] sm:$0xff]  ;;  %v3418_v54 = vld [vmem:[%s4255_s0 + $0x40] sm:$0xff] }
 0x36f   : > { %v1862_v57 = vmul.f32 %v4657_v62, %v1861_v38  ;;  %v3440_v62 = vld [vmem:[%s4255_s0 + $0xf0] sm:$0xff]  ;;  %2286 = vmatpush.bf16.msra.mxu0 %v3416_v63  ;;  %2305 = vmatpush.bf16.msra.mxu1 %v3418_v54 }
 0x370   : > { %v1896_v58 = vpack.c.bf16 %v1892_v56, %v1892_v56  ;;  %2325 = vmatpush.bf16.msra.mxu3 %v3440_v62 }
 0x371   : > { %v1894_v39 = vpack.c.bf16 %v1862_v57, %v1862_v57  ;;  %2318 = vmatpush.bf16.msra.mxu2 %v3426_v42 }
 0x372   : > { %3114 = vmatmul.msk.bf16.vlgmr.msrb.gmra.mxu3 %vm1796_vm5, %v1896_v58 }
 0x373   : > { %3112 = vmatmul.msk.bf16.vlgmr.msrb.gmra.mxu1 %vm1796_vm5, %v1894_v39  ;;  %2287 = vmatpush.bf16.msra.mxu0 %v3415_v5 }
 0x374   : > { %2326 = vmatpush.bf16.msra.mxu3 %v3439_v6 }
 0x377   : > { %2288 = vmatpush.bf16.msra.mxu0 %v3414_v8 }
 0x378   : > { %2327 = vmatpush.bf16.msra.mxu3 %v3438_v9 }
 0x37b   : > { %2289 = vmatpush.bf16.msra.mxu0 %v3413_v35 }
 0x37c   : > { %2328 = vmatpush.bf16.msra.mxu3 %v3437_v15 }
 0x37f   : > { %2290 = vmatpush.bf16.msra.mxu0 %v3412_v20 }
 0x380   : > { %2329 = vmatpush.bf16.msra.mxu3 %v3436_v21 }
 0x383   : > { %2291 = vmatpush.bf16.msra.mxu0 %v3411_v28 }
 0x384   : > { %2330 = vmatpush.bf16.msra.mxu3 %v3435_v30 }
 0x387   : > { %2292 = vmatpush.bf16.msra.mxu0 %v3410_v45 }
 0x388   : > { %2331 = vmatpush.bf16.msra.mxu3 %v3434_v46 }
 0x3d7   : > { %v1917_v2 = vpop.f32.mrf.mxu0 }
 0x3d8   : > { %v1980_v16 = vrot.slane %v1917_v2, 4 }
 0x3df   : > { %v1919_v0 = vpop.f32.mrf.mxu0 }
 0x3ed   : > { %v1955_v18 = vpop.f32.mrf.mxu2 }
 0x3ee   : > { %v1978_v17 = vrot.slane %v1955_v18, 4  ;;  %v1981_v22 = vsel %vm1405_vm3, %v1955_v18, %v1980_v16 }
 0x3ef   : > { %v1989_v27 = vperm.slane %v1981_v22, %v4491_v14 }
 0x3f0   : > { %v1936_v23 = vpop.f32.mrf.mxu1  ;;  %v1979_v24 = vsel %vm1405_vm3, %v1978_v17, %v1917_v2 }
 0x3f1   : > { %v1992_v31 = vrot.slane %v1936_v23, 4  ;;  %v1985_v1 = vperm.slane %v1979_v24, %v4491_v14  ;;  %v2016_v43 = vrot.slane %v1989_v27, 4 }
 0x3f3   : > { %v2004_v49 = vrot.slane %v1985_v1, 4 }
 0x3f5   : > { %v1957_v34 = vpop.f32.mrf.mxu2  ;;  %v1974_v36 = vpop.f32.mrf.mxu3 }
 0x3f6   : > { %v1990_v37 = vrot.slane %v1974_v36, 4  ;;  %v1993_v40 = vsel %vm1405_vm3, %v1974_v36, %v1992_v31 }
 0x3f7   : > { %v2001_v44 = vperm.slane %v1993_v40, %v4491_v14 }
 0x3f8   : > { %v1991_v47 = vsel %vm1405_vm3, %v1990_v37, %v1936_v23  ;;  %v1938_v48 = vpop.f32.mrf.mxu1 }
 0x3f9   : > { %v1997_v50 = vperm.slane %v1991_v47, %v4491_v14  ;;  %v2014_v51 = vrot.slane %v2001_v44, 4  ;;  %v2017_v52 = vsel %vm1405_vm3, %v2001_v44, %v2016_v43 }
 0x3fa   : > { %v2025_v53 = vperm.slane %v2017_v52, %v4501_v33 }
 0x3fb   : > { %v2002_v56 = vrot.slane %v1997_v50, 4  ;;  %v2005_v38 = vsel %vm1405_vm3, %v1997_v50, %v2004_v49  ;;  %v2015_v57 = vsel %vm1405_vm3, %v2014_v51, %v1989_v27 }
 0x3fc   : > { %v2013_v58 = vperm.slane %v2005_v38, %v4501_v33  ;;  %v2021_v39 = vperm.slane %v2015_v57, %v4501_v33  ;;  %v2032_v55 = vrot.slane %v2025_v53, 4 }
 0x3fd   : > { %v2003_v59 = vsel %vm1405_vm3, %v2002_v56, %v1985_v1  ;;  %v1976_v60 = vpop.f32.mrf.mxu3 }
 0x3fe   : > { %v2009_v61 = vperm.slane %v2003_v59, %v4501_v33  ;;  %v2028_v10 = vrot.slane %v2013_v58, 4  ;;  %v2030_v63 = vrot.slane %v2021_v39, 4  ;;  %v2033_v62 = vsel %vm1405_vm3, 0.0, %v2032_v55  ;;  %v3449_v58 = vld [vmem:[%s4257_s22 + $0x38] sm:$0xff]  ;;  %v3447_v60 = vld [vmem:[%s4257_s22 + $0x28] sm:$0xff] }
 0x3ff   : > { %v2045_v2 = vsel %vm1405_vm3, %v2032_v55, %v2021_v39  ;;  %v2050_v0 = vrot.slane %v2033_v62, 4  ;;  %2415 = vmatpush.bf16.msrb.mxu0 %v3449_v58  ;;  %v3448_v39 = vld [vmem:[%s4257_s22 + $0x30] sm:$0xff]  ;;  %v3446_v62 = vld [vmem:[%s4257_s22 + $0x20] sm:$0xff] }
 0x400   : > { %v2026_v3 = vrot.slane %v2009_v61, 4  ;;  %v2029_v4 = vsel %vm1405_vm3, 0.0, %v2028_v10  ;;  %v2031_v5 = vsel %vm1405_vm3, 0.0, %v2030_v63  ;;  %v2034_v6 = vsel %vm1405_vm3, %v2028_v10, %v2009_v61 }
 0x401   : > { %v2038_v7 = vperm.slane %v2034_v6, %v4491_v14  ;;  %v2039_v13 = vrot.slane %v2029_v4, 4  ;;  %v2049_v8 = vperm.slane %v2045_v2, %v4491_v14  ;;  %v2051_v9 = vsel %vm1405_vm3, %v2050_v0, %v2031_v5  ;;  %v3457_v2 = vld [vmem:[%s4259_s10 + $0x38] sm:$0xff]  ;;  %v3455_v6 = vld [vmem:[%s4259_s10 + $0x28] sm:$0xff] }
 0x402   : > { %v2027_v11 = vsel %vm1405_vm3, 0.0, %v2026_v3  ;;  %v2055_v12 = vperm.slane %v2051_v9, %v4491_v14  ;;  %2479 = vmatpush.bf16.msrb.mxu1 %v3457_v2  ;;  %v3456_v3 = vld [vmem:[%s4259_s10 + $0x30] sm:$0xff]  ;;  %v3445_v5 = vld [vmem:[%s4257_s22 + $0x18] sm:$0xff]  ;;  %v3443_v9 = vld [vmem:[%s4257_s22 + $0x8] sm:$0xff] }
 0x403   : > { %v2070_v35 = vrot.slane %v2049_v8, 4  ;;  %v2040_v15 = vsel %vm1405_vm3, %v2039_v13, %v2027_v11  ;;  %v2058_v18 = vrot.slane %v2038_v7, 4  ;;  %2416 = vmatpush.bf16.msrb.mxu0 %v3448_v39  ;;  %v3454_v13 = vld [vmem:[%s4259_s10 + $0x20] sm:$0xff] }
 0x404   : > { %v2068_v16 = vrot.slane %v2055_v12, 4  ;;  %v2044_v17 = vperm.slane %v2040_v15, %v4491_v14  ;;  %v3442_v15 = vld [vmem:[%s4257_s22] sm:$0xff] }
 0x405   : > { %v2071_v29 = vsel %vm1405_vm3, %v2055_v12, %v2070_v35  ;;  %v3453_v12 = vld [vmem:[%s4259_s10 + $0x18] sm:$0xff] }
 0x406   : > { %v2059_v19 = vsel %vm1405_vm3, %v2044_v17, %v2058_v18  ;;  %v2079_v20 = vperm.slane %v2071_v29, %v4501_v33  ;;  %v2056_v21 = vrot.slane %v2044_v17, 4  ;;  %v2069_v22 = vsel %vm1405_vm3, %v2068_v16, %v2049_v8  ;;  %2480 = vmatpush.bf16.msrb.mxu1 %v3456_v3  ;;  %v3452_v16 = vld [vmem:[%s4259_s10 + $0x10] sm:$0xff] }
 0x407   : > { %v2067_v23 = vperm.slane %v2059_v19, %v4501_v33  ;;  %v2075_v24 = vperm.slane %v2069_v22, %v4501_v33  ;;  %2417 = vmatpush.bf16.msrb.mxu0 %v3447_v60 }
 0x408   : > { %v2084_v25 = vrot.slane %v2079_v20, 4  ;;  %v2057_v26 = vsel %vm1405_vm3, %v2056_v21, %v2038_v7  ;;  %v3444_v7 = vld [vmem:[%s4257_s22 + $0x10] sm:$0xff] }
 0x409   : > { %v2063_v27 = vperm.slane %v2057_v26, %v4501_v33  ;;  %v2080_v14 = vrot.slane %v2075_v24, 4  ;;  %v2086_v28 = vrot.slane %v2067_v23, 4  ;;  %v4744_v33 = vld [vmem:[%s4247_s3] sm:$0xff]  ;;  %s3853_s3 = sshra.s32 %s2510_s1, 4  ;;  %s3854_s3 = int_to_ptr.hbm [resolvable:$true] %s3853_s3 }
 0x40a   : > { %v2085_v30 = vsel %vm1405_vm3, %v2084_v25, %v2067_v23  ;;  %v2092_v43 = vperm.slane %v4744_v33, 3  ;;  %2481 = vmatpush.bf16.msrb.mxu1 %v3455_v6  ;;  %v2363_v23 = vperm.slane %v4744_v33, 5  ;;  %s3855_s15 = scalar_lea.hbm %s3854_s3, 8  ;;  %p3860_p5 = scmp.lt.s32.totalorder %s3854_s3, %s4867_s16 }
 0x40b   : > { %v2090_v31 = vpack.c.bf16 %v2085_v30, %v2085_v30  ;;  %v2081_v1 = vsel %vm1405_vm3, %v2080_v14, %v2063_v27  ;;  %v2087_v34 = vsel %vm1405_vm3, %v2079_v20, %v2086_v28  ;;  %v2082_v36 = vrot.slane %v2063_v27, 4  ;;  %2418 = vmatpush.bf16.msrb.mxu0 %v3446_v62  ;;  %v3451_v27 = vld [vmem:[%s4259_s10 + $0x8] sm:$0xff]  ;;  %v3450_v14 = vld [vmem:[%s4259_s10] sm:$0xff]  ;;  %p3856_p0 = scmp.ne.s32.totalorder %s3854_s3, %s3855_s15  ;;  %p3861_p6 = scmp.lt.s32.totalorder %s3859_s8, %s3855_s15 }
 0x40c   : > { %v2088_v37 = vpack.c.bf16 %v2081_v1, %v2081_v1  ;;  %v2091_v40 = vpack.c.bf16 %v2087_v34, %v2087_v34  ;;  %v2361_v20 = vperm.slane %v4744_v33, 4  ;;  %v2366_v28 = vperm.slane %v4744_v33, 6 }
 0x40d   : > { %2319 = vmatmul.bf16.vlgmr.msra.gmra.mxu2 %v2090_v31  ;;  %v2083_v41 = vsel %vm1405_vm3, %v2075_v24, %v2082_v36  ;;  %p3857_p2 = pnand %p3856_p0, %p4205_p9  ;;  %p3862_p7 = por %p3861_p6, %p3860_p5 }
 0x40e   : > { %2293 = vmatmul.bf16.vlgmr.msra.gmra.mxu0 %v2088_v37  ;;  %2332 = vmatmul.bf16.vlgmr.msra.gmra.mxu3 %v2091_v40  ;;  %v2089_v42 = vpack.c.bf16 %v2083_v41, %v2083_v41  ;;  %v2430_v37 = vperm.slane %v4744_v33, 7 }
 0x40f   : > { %2419 = vmatpush.bf16.msrb.mxu0 %v3445_v5  ;;  %2482 = vmatpush.bf16.msrb.mxu1 %v3454_v13  ;;  %p3858_p4 = pneg %p3857_p2 }
 0x410   : > { %2306 = vmatmul.bf16.vlgmr.msra.gmra.mxu1 %v2089_v42 }
 0x411   : > { %p3863_p8 = pnand %p3862_p7, %p3858_p4 }
 0x413   : > { %2420 = vmatpush.bf16.msrb.mxu0 %v3444_v7  ;;  %2483 = vmatpush.bf16.msrb.mxu1 %v3453_v12 }
 0x417   : > { %2421 = vmatpush.bf16.msrb.mxu0 %v3443_v9  ;;  %2484 = vmatpush.bf16.msrb.mxu1 %v3452_v16 }
 0x41b   : > { %2422 = vmatpush.bf16.msrb.mxu0 %v3442_v15  ;;  %2485 = vmatpush.bf16.msrb.mxu1 %v3451_v27 }
 0x41f   : > { %2486 = vmatpush.bf16.msrb.mxu1 %v3450_v14 }
 0x48b   : > { %v2294_v44 = vpop.f32.mrf.mxu0 }
 0x48c   : > { %v2295_v45 = vadd.f32 %v2294_v44, %v2092_v43 }
 0x48d   : > { %v2307_v46 = vpop.f32.mrf.mxu1 }
 0x48e   : > { %v2308_v47 = vadd.f32 %v2307_v46, %v2295_v45 }
 0x490   : > { %v2320_v48 = vpop.f32.mrf.mxu2 }
 0x491   : > { %v2321_v49 = vadd.f32 %v2320_v48, %v2308_v47  ;;  %v2333_v50 = vpop.f32.mrf.mxu3 }
 0x493   : > { %v2334_v51 = vadd.f32 %v2333_v50, %v2321_v49  ;;  %v2296_v52 = vpop.f32.mrf.mxu0 }
 0x495   : > { %v2337_v53 = vadd.f32 %v2334_v51, %v4410_v32  ;;  %v2309_v54 = vpop.f32.mrf.mxu1 }
 0x497   : > { %2338 = vadd.xlane.f32.xlu1 %v2337_v53  ;;  %v2341_v56 = vmul.f32 %v2337_v53, %v2337_v53 }
 0x498   : > { %v2322_v38 = vpop.f32.mrf.mxu2 }
 0x499   : > { %2342 = vadd.xlane.f32.xlu2 %v2341_v56  ;;  %v2335_v57 = vpop.f32.mrf.mxu3 }
 0x50a   : > { %v2339_v55 = vpop.xlane.xlu1 %2338 }
 0x50b   : > { %v2340_v59 = vmul.f32 0.03125, %v2339_v55 }
 0x50c   : > { %v2343_v61 = vpop.xlane.xlu2 %2342 }
 0x50d   : > { %v2345_v32 = vmul.f32 %v2340_v59, %v2340_v59  ;;  %v2344_v10 = vmul.f32 0.03125, %v2343_v61  ;;  %v2348_v19 = vsub.f32 %v2337_v53, %v2340_v59 }
 0x50f   : > { %v2346_v63 = vsub.f32 %v2344_v10, %v2345_v32 }
 0x511   : > { %v2347_v0 = vmax.f32 %v2346_v63, 0.0 }
 0x513   : > { %v2349_v4 = vadd.f32 1e-12, %v2347_v0 }
 0x515   : > { %3626 = vrsqrt.f32 %v2349_v4  ;;  %vm2356_vm5 = vweird.f32 %v2349_v4 }
 0x51b   : > { %v3627_v8 = vpop.eup %3626 }
 0x51c   : > { %v2351_v11 = vmul.f32 %v3627_v8, %v2349_v4  ;;  %vm2357_vm3 = vweird.f32 %v3627_v8 }
 0x51d   : > { %vm2358_vm8 = vmor %vm2356_vm5, %vm2357_vm3 }
 0x51e   : > { %v2352_v35 = vmul.f32 %v3627_v8, %v2351_v11 }
 0x520   : > { %v2353_v18 = vmul.f32 0.5, %v2352_v35 }
 0x522   : > { %v2354_v17 = vsub.f32 1.5, %v2353_v18 }
 0x524   : > { %v2355_v29 = vmul.f32 %v3627_v8, %v2354_v17 }
 0x526   : > { %v2359_v21 = vsel %vm2358_vm8, %v3627_v8, %v2355_v29 }
 0x527   : > { %v2360_v22 = vmul.f32 %v2359_v21, %v2348_v19 }
 0x529   : > { %v2362_v24 = vmul.f32 %v2361_v20, %v2360_v22 }
 0x52b   : > { %v2364_v25 = vadd.f32 %v2363_v23, %v2362_v24 }
 0x52d   : > { %v2365_v26 = vpack.c.bf16 %v2364_v25, %v2364_v25 }
 0x52f   : > { %2423 = vmatmul.bf16.vlgmr.msrb.gmra.mxu0 %v2365_v26 }
 0x5ac   : > { %v2424_v30 = vpop.f32.mrf.mxu0 }
 0x5ad   : > { %v2425_v31 = vadd.f32 %v2424_v30, %v2366_v28 }
 0x5af   : > { %v2428_v1 = vmax.f32 %v2425_v31, 0.0 }
 0x5b1   : > { %v2429_v34 = vpack.c.bf16 %v2428_v1, %v2428_v1 }
 0x5b3   : > { %2487 = vmatmul.bf16.vlgmr.msrb.gmra.mxu1 %v2429_v34 }
 0x5b4   : > { %v2426_v36 = vpop.f32.mrf.mxu0 }
 0x630   : > { %v2488_v40 = vpop.f32.mrf.mxu1 }
 0x631   : > { %v2489_v41 = vadd.f32 %v2488_v40, %v2430_v37 }
 0x633   : > { %v2492_v42 = vadd.f32 %v2489_v41, %v2364_v25 }
 0x635   : > { %2493 = vst [vmem:[%s4261_s20] sm:$0xff] %v2492_v42 }
 0x636   : > { %3866 = shalt.err (!%p3863_p8)
}
 0x637   : > { %3480 = dma.vmem_to_hbm [thread:$0]  (%p4205_p9), %s2508_s7, 128, %s2510_s1, %s2495_s2  }
 0x638   : > { %v2490_v33 = vpop.f32.mrf.mxu1 }
 0x639 PF: > { %p3512_p10 = scmp.ge.s32.totalorder %s3969_s11, 2  ;;  %s2521_s14 = sand.u32 1, %s3941_s27  }
 0x63a   : > { %s2522_s10 = scalar_lea.sflag [#allocation4], %s2521_s14 }
 0x63b   : > { %p3506_p3 = pnand %p3512_p10, %p4114_p11 }
 0x63d   : > { %p3507_p12 = pneg %p3506_p3 }
 0x63f   : > { %3924 = dma.done.wait (%p3507_p12), %s2522_s10, 128  }
 0x640   : > { %3926 = vsyncadd (%p3507_p12), %s2522_s10, 4294967168  ;;  %s24_s11 = sadd.s32 1, %s3969_s11   ;;  %s4868_s20 = sld [smem:[#allocation17_spill]] }
 0x641   : > { %p21_p1 = scmp.ge.s32.totalorder %s24_s11, 6   ;;  %s4869_s26 = sld [smem:[#allocation23_spill]] }
 0x642   : > { %s4870_s12 = sld [smem:[#allocation24_spill]]  ;;  %s4874_s24 = smov %s3933_s25 }
 0x643   : > { %s4871_s8 = sld [smem:[#allocation20_spill]]  ;;  %s4876_s27 = smov %s3945_s28 }
 0x644   : > { %s4872_s21 = sld [smem:[#allocation21_spill]]  ;;  %s4877_s28 = smov %s3949_s29 }
 0x645   : > { %s4873_s10 = sld [smem:[#allocation22_spill]]  ;;  %s4879_s30 = smov %s3961_s9 }
 0x646   : > { %s4875_s25 = smov %s4868_s20  ;;  %23 = sbr.rel (!%p21_p1) target bundleno = 16 (0x10), region = 156 }
 0x648   : > { %s4878_s29 = smov %s4870_s12 }
 0x64a   : > { %s4880_s9 = smov %s4872_s21 }
 0x64b   :  { %2528 = vsyncpa [#allocation3], 1 }
 0x64c   :  { %2530 = vsyncpa [#allocation3 + $0x1], 1 }
 0x64d   :  { %2531 = vsyncpa [#allocation6], 1 }
 0x64e   :  { %2532 = vsyncpa [#allocation4], 1 }
 0x64f   :  { %2534 = vsyncpa [#allocation4 + $0x1], 1 }

</bundles_post_ra>
